<compile_context>
chip_gen: v6e
topology: v6e:2x2x1
jax: 0.10.0
libtpu: 0.0.40
codegen_flags: <defaults>
</compile_context>

<pallas_src>
import jax
import jax.numpy as jnp
from jax.experimental import pallas as pl
from jax.experimental.pallas import tpu as pltpu


LN_EPS = 1e-5  # torch.nn.LayerNorm default


def _erf(x):
    """Abramowitz & Stegun 7.1.26 erf approximation (|err| <= 1.5e-7).

    Uses only mul/add/div/exp, which all lower natively in Mosaic; avoids any
    dependence on an erf primitive lowering inside Pallas TPU."""
    a1, a2, a3, a4, a5 = (0.254829592, -0.284496736, 1.421413741,
                          -1.453152027, 1.061405429)
    p = 0.3275911
    ax = jnp.abs(x)
    t = 1.0 / (1.0 + p * ax)
    poly = ((((a5 * t + a4) * t + a3) * t + a2) * t + a1) * t
    y = 1.0 - poly * jnp.exp(-ax * ax)
    return jnp.where(x < 0.0, -y, y)


def _gelu_ln(z, gamma, beta):
    """Exact-style (erf) GELU -> affine LayerNorm (two-pass statistics)."""
    a = 0.5 * z * (1.0 + _erf(z * 0.7071067811865476))   # nn.GELU() default
    mu = jnp.mean(a, axis=-1, keepdims=True)
    d = a - mu
    var = jnp.mean(d * d, axis=-1, keepdims=True)
    return d * jax.lax.rsqrt(var + LN_EPS) * gamma + beta


def critic_kernel(obs_ref, act_ref,
                  w1o_ref, w1a_ref, b1_ref, g1_ref, be1_ref,
                  w2_ref, b2_ref, g2_ref, be2_ref,
                  w3_ref, b3_ref, g3_ref, be3_ref,
                  w4_ref, b4_ref, g4_ref, be4_ref,
                  wf_ref, bf_ref,
                  out_ref):
    obs = obs_ref[...]                                   # (B, D_obs) f32
    act = act_ref[...]                                   # (B, D_act) f32
    num_critics = w2_ref.shape[0]

    for c in range(num_critics):                         # fully unrolled (C is tiny)
        # Layer 1: fused "concat" via split matmul against pre-split weights.
        z = (jnp.dot(obs, w1o_ref[c].astype(jnp.float32),
                     preferred_element_type=jnp.float32)
             + jnp.dot(act, w1a_ref[c].astype(jnp.float32),
                       preferred_element_type=jnp.float32)
             + b1_ref[c])                                # (B,H) + (1,H)
        h = _gelu_ln(z, g1_ref[c], be1_ref[c])

        # Layers 2-4.
        for w_ref, b_ref, g_ref, be_ref in (
                (w2_ref, b2_ref, g2_ref, be2_ref),
                (w3_ref, b3_ref, g3_ref, be3_ref),
                (w4_ref, b4_ref, g4_ref, be4_ref)):
            z = jnp.dot(h, w_ref[c].astype(jnp.float32),
                        preferred_element_type=jnp.float32) + b_ref[c]
            h = _gelu_ln(z, g_ref[c], be_ref[c])

        # Final Linear(H, 1): VPU multiply + lane reduction (no N=1 matmul).
        q = jnp.sum(h * wf_ref[c], axis=-1, keepdims=True) + bf_ref[c]   # (B, 1)
        out_ref[:, c:c + 1] = q.astype(out_ref.dtype)


def critic_forward(observations, actions, params):
    """params: stacked per-critic parameters (leading axis = num_critics).

    Hidden weights are stored in bfloat16 (halves HBM->VMEM DMA); biases,
    LayerNorm params, final projection and all math are float32.
    Returns (num_critics, batch) Q-values, like torch.stack([q.squeeze(-1)]).
    """
    C = params["w2"].shape[0]
    B = observations.shape[0]

    vmem = pl.BlockSpec(memory_space=pltpu.MemorySpace.VMEM)  # whole array in VMEM
    args = (observations, actions,
            params["w1o"], params["w1a"], params["b1"], params["g1"], params["be1"],
            params["w2"], params["b2"], params["g2"], params["be2"],
            params["w3"], params["b3"], params["g3"], params["be3"],
            params["w4"], params["b4"], params["g4"], params["be4"],
            params["wf"], params["bf"])

    out = pl.pallas_call(
        critic_kernel,
        out_shape=jax.ShapeDtypeStruct((B, C), jnp.float32),
        in_specs=[vmem] * len(args),
        out_specs=vmem,
    )(*args)
    return out.T                                           # (num_critics, batch)


def init_params(key, state_dim, action_dim, hidden_dim, num_critics):
    """Synthetic init mirroring torch: orthogonal weights (gain 1.0 / 0.01),
    zero biases, LayerNorm gamma=1 / beta=0. Hidden weights stored as bf16.
    Layer-1 weight is orthogonalized as a whole then split into obs/act halves."""
    d_in = state_dim + action_dim
    orth1 = jax.nn.initializers.orthogonal(scale=1.0)
    orthf = jax.nn.initializers.orthogonal(scale=0.01)
    keys = jax.random.split(key, num_critics * 5)
    p = {}
    dims = [(d_in, hidden_dim)] + [(hidden_dim, hidden_dim)] * 3
    for li, (din, dout) in enumerate(dims, start=1):
        ws = [orth1(keys[c * 5 + (li - 1)], (din, dout), jnp.float32)
              for c in range(num_critics)]
        w = jnp.stack(ws)                                          # (C, din, dout)
        if li == 1:
            p["w1o"] = w[:, :state_dim, :].astype(jnp.bfloat16)    # (C, D_obs, H)
            p["w1a"] = w[:, state_dim:, :].astype(jnp.bfloat16)    # (C, D_act, H)
        else:
            p[f"w{li}"] = w.astype(jnp.bfloat16)                   # (C, H, H)
        p[f"b{li}"] = jnp.zeros((num_critics, 1, dout), jnp.float32)
        p[f"g{li}"] = jnp.ones((num_critics, 1, dout), jnp.float32)
        p[f"be{li}"] = jnp.zeros((num_critics, 1, dout), jnp.float32)
    wfs = [orthf(keys[c * 5 + 4], (hidden_dim, 1), jnp.float32)[:, 0]
           for c in range(num_critics)]
    p["wf"] = jnp.stack(wfs)[:, None, :]                           # (C, 1, H) f32
    p["bf"] = jnp.zeros((num_critics, 1, 1), jnp.float32)
    return p


def critic_forward_ref(observations, actions, params):
    """Pure-JAX reference (same bf16-stored weights upcast to f32, exact erf GELU)."""
    x = jnp.concatenate([observations, actions], axis=-1)
    C = params["w2"].shape[0]
    w1 = jnp.concatenate([params["w1o"], params["w1a"]], axis=1).astype(jnp.float32)
    qs = []
    for c in range(C):
        h = x
        for li in range(1, 5):
            w = w1[c] if li == 1 else params[f"w{li}"][c].astype(jnp.float32)
            z = h @ w + params[f"b{li}"][c]
            a = jax.nn.gelu(z, approximate=False)
            mu = jnp.mean(a, axis=-1, keepdims=True)
            var = jnp.mean((a - mu) ** 2, axis=-1, keepdims=True)
            h = (a - mu) * jax.lax.rsqrt(var + LN_EPS)
            h = h * params[f"g{li}"][c] + params[f"be{li}"][c]
        q = jnp.sum(h * params["wf"][c], axis=-1) + params["bf"][c, 0, 0]   # (B,)
        qs.append(q)
    return jnp.stack(qs)


if __name__ == "__main__":
    # Small shapes consistent with the module: state_dim=24, action_dim=8,
    # batch=8, hidden_dims=(128, 128, 128, 128), num_critics=2.
    state_dim, action_dim, hidden_dim, num_critics, batch = 24, 8, 128, 2, 8

    key = jax.random.PRNGKey(0)
    k_obs, k_act, k_par = jax.random.split(key, 3)
    observations = jax.random.normal(k_obs, (batch, state_dim), jnp.float32)
    actions = jax.random.normal(k_act, (batch, action_dim), jnp.float32)
    params = init_params(k_par, state_dim, action_dim, hidden_dim, num_critics)

    q = jax.jit(critic_forward)(observations, actions, params)
    q = jax.block_until_ready(q)

    q_ref = critic_forward_ref(observations, actions, params)
    assert q.shape == (num_critics, batch), q.shape
    assert jnp.allclose(q, q_ref, rtol=1e-3, atol=1e-4), (q, q_ref)

    print("KERNEL_OK")
</pallas_src>

<mosaic_0001>
module attributes {stable_mosaic.version = 11 : i64} {
  func.func @critic_kernel(%arg0: memref<8x24xf32, #tpu.memory_space<vmem>>, %arg1: memref<8x8xf32, #tpu.memory_space<vmem>>, %arg2: memref<2x24x128xbf16, #tpu.memory_space<vmem>>, %arg3: memref<2x8x128xbf16, #tpu.memory_space<vmem>>, %arg4: memref<2x1x128xf32, #tpu.memory_space<vmem>>, %arg5: memref<2x1x128xf32, #tpu.memory_space<vmem>>, %arg6: memref<2x1x128xf32, #tpu.memory_space<vmem>>, %arg7: memref<2x128x128xbf16, #tpu.memory_space<vmem>>, %arg8: memref<2x1x128xf32, #tpu.memory_space<vmem>>, %arg9: memref<2x1x128xf32, #tpu.memory_space<vmem>>, %arg10: memref<2x1x128xf32, #tpu.memory_space<vmem>>, %arg11: memref<2x128x128xbf16, #tpu.memory_space<vmem>>, %arg12: memref<2x1x128xf32, #tpu.memory_space<vmem>>, %arg13: memref<2x1x128xf32, #tpu.memory_space<vmem>>, %arg14: memref<2x1x128xf32, #tpu.memory_space<vmem>>, %arg15: memref<2x128x128xbf16, #tpu.memory_space<vmem>>, %arg16: memref<2x1x128xf32, #tpu.memory_space<vmem>>, %arg17: memref<2x1x128xf32, #tpu.memory_space<vmem>>, %arg18: memref<2x1x128xf32, #tpu.memory_space<vmem>>, %arg19: memref<2x1x128xf32, #tpu.memory_space<vmem>>, %arg20: memref<2x1x1xf32, #tpu.memory_space<vmem>>, %arg21: memref<8x2xf32, #tpu.memory_space<vmem>>) attributes {dimension_semantics = [], scalar_prefetch = 0 : i64, scratch_operands = 0 : i64, tpu.core_type = #tpu.core_type<tc>} {
    %c0 = arith.constant 0 : index
    %c0_0 = arith.constant 0 : index
    %0 = vector.load %arg0[%c0, %c0_0] : memref<8x24xf32, #tpu.memory_space<vmem>>, vector<8x24xf32>
    %c0_1 = arith.constant 0 : index
    %c0_2 = arith.constant 0 : index
    %1 = vector.load %arg1[%c0_1, %c0_2] : memref<8x8xf32, #tpu.memory_space<vmem>>, vector<8x8xf32>
    %c0_3 = arith.constant 0 : index
    %c0_4 = arith.constant 0 : index
    %c0_5 = arith.constant 0 : index
    %2 = vector.load %arg2[%c0_3, %c0_4, %c0_5] : memref<2x24x128xbf16, #tpu.memory_space<vmem>>, vector<1x24x128xbf16>
    %3 = vector.shape_cast %2 : vector<1x24x128xbf16> to vector<24x128xbf16>
    %4 = arith.extf %3 : vector<24x128xbf16> to vector<24x128xf32>
    %cst = arith.constant dense<0.000000e+00> : vector<8x128xf32>
    %5 = tpu.matmul %0, %4, %cst {dimension_numbers = #tpu.dot_dimension_numbers<[1], [0], [0], [1], [0, 0, 1, 1], [], []>} : vector<8x24xf32>, vector<24x128xf32>, vector<8x128xf32> -> vector<8x128xf32>
    %c0_6 = arith.constant 0 : index
    %c0_7 = arith.constant 0 : index
    %c0_8 = arith.constant 0 : index
    %6 = vector.load %arg3[%c0_6, %c0_7, %c0_8] : memref<2x8x128xbf16, #tpu.memory_space<vmem>>, vector<1x8x128xbf16>
    %7 = vector.shape_cast %6 : vector<1x8x128xbf16> to vector<8x128xbf16>
    %8 = arith.extf %7 : vector<8x128xbf16> to vector<8x128xf32>
    %cst_9 = arith.constant dense<0.000000e+00> : vector<8x128xf32>
    %9 = tpu.matmul %1, %8, %cst_9 {dimension_numbers = #tpu.dot_dimension_numbers<[1], [0], [0], [1], [0, 0, 1, 1], [], []>} : vector<8x8xf32>, vector<8x128xf32>, vector<8x128xf32> -> vector<8x128xf32>
    %10 = arith.addf %5, %9 : vector<8x128xf32>
    %c0_10 = arith.constant 0 : index
    %c0_11 = arith.constant 0 : index
    %c0_12 = arith.constant 0 : index
    %11 = vector.load %arg4[%c0_10, %c0_11, %c0_12] : memref<2x1x128xf32, #tpu.memory_space<vmem>>, vector<1x1x128xf32>
    %12 = vector.shape_cast %11 : vector<1x1x128xf32> to vector<1x128xf32>
    %13 = vector.broadcast %12 : vector<1x128xf32> to vector<8x128xf32>
    %14 = arith.addf %10, %13 : vector<8x128xf32>
    %c0_13 = arith.constant 0 : index
    %c0_14 = arith.constant 0 : index
    %c0_15 = arith.constant 0 : index
    %15 = vector.load %arg5[%c0_13, %c0_14, %c0_15] : memref<2x1x128xf32, #tpu.memory_space<vmem>>, vector<1x1x128xf32>
    %16 = vector.shape_cast %15 : vector<1x1x128xf32> to vector<1x128xf32>
    %c0_16 = arith.constant 0 : index
    %c0_17 = arith.constant 0 : index
    %c0_18 = arith.constant 0 : index
    %17 = vector.load %arg6[%c0_16, %c0_17, %c0_18] : memref<2x1x128xf32, #tpu.memory_space<vmem>>, vector<1x1x128xf32>
    %18 = vector.shape_cast %17 : vector<1x1x128xf32> to vector<1x128xf32>
    %cst_19 = arith.constant 5.000000e-01 : f32
    %19 = vector.broadcast %cst_19 : f32 to vector<8x128xf32>
    %20 = arith.mulf %19, %14 : vector<8x128xf32>
    %cst_20 = arith.constant 0.707106769 : f32
    %21 = vector.broadcast %cst_20 : f32 to vector<8x128xf32>
    %22 = arith.mulf %14, %21 : vector<8x128xf32>
    %23 = math.absf %22 : vector<8x128xf32>
    %cst_21 = arith.constant 0.327591091 : f32
    %24 = vector.broadcast %cst_21 : f32 to vector<8x128xf32>
    %25 = arith.mulf %24, %23 : vector<8x128xf32>
    %cst_22 = arith.constant 1.000000e+00 : f32
    %26 = vector.broadcast %cst_22 : f32 to vector<8x128xf32>
    %27 = arith.addf %26, %25 : vector<8x128xf32>
    %cst_23 = arith.constant 1.000000e+00 : f32
    %28 = vector.broadcast %cst_23 : f32 to vector<8x128xf32>
    %29 = arith.divf %28, %27 : vector<8x128xf32>
    %cst_24 = arith.constant 1.06140542 : f32
    %30 = vector.broadcast %cst_24 : f32 to vector<8x128xf32>
    %31 = arith.mulf %30, %29 : vector<8x128xf32>
    %cst_25 = arith.constant -1.45315206 : f32
    %32 = vector.broadcast %cst_25 : f32 to vector<8x128xf32>
    %33 = arith.addf %31, %32 : vector<8x128xf32>
    %34 = arith.mulf %33, %29 : vector<8x128xf32>
    %cst_26 = arith.constant 1.42141378 : f32
    %35 = vector.broadcast %cst_26 : f32 to vector<8x128xf32>
    %36 = arith.addf %34, %35 : vector<8x128xf32>
    %37 = arith.mulf %36, %29 : vector<8x128xf32>
    %cst_27 = arith.constant -0.284496725 : f32
    %38 = vector.broadcast %cst_27 : f32 to vector<8x128xf32>
    %39 = arith.addf %37, %38 : vector<8x128xf32>
    %40 = arith.mulf %39, %29 : vector<8x128xf32>
    %cst_28 = arith.constant 0.254829586 : f32
    %41 = vector.broadcast %cst_28 : f32 to vector<8x128xf32>
    %42 = arith.addf %40, %41 : vector<8x128xf32>
    %43 = arith.mulf %42, %29 : vector<8x128xf32>
    %cst_29 = arith.constant 0.000000e+00 : f32
    %44 = vector.broadcast %cst_29 : f32 to vector<8x128xf32>
    %45 = arith.subf %44, %23 : vector<8x128xf32>
    %46 = arith.mulf %45, %23 : vector<8x128xf32>
    %47 = math.exp %46 : vector<8x128xf32>
    %48 = arith.mulf %43, %47 : vector<8x128xf32>
    %cst_30 = arith.constant 1.000000e+00 : f32
    %49 = vector.broadcast %cst_30 : f32 to vector<8x128xf32>
    %50 = arith.subf %49, %48 : vector<8x128xf32>
    %cst_31 = arith.constant 0.000000e+00 : f32
    %51 = vector.broadcast %cst_31 : f32 to vector<8x128xf32>
    %52 = arith.cmpf olt, %22, %51 : vector<8x128xf32>
    %cst_32 = arith.constant 0.000000e+00 : f32
    %53 = vector.broadcast %cst_32 : f32 to vector<8x128xf32>
    %54 = arith.subf %53, %50 : vector<8x128xf32>
    %55 = arith.select %52, %54, %50 : vector<8x128xi1>, vector<8x128xf32>
    %cst_33 = arith.constant 1.000000e+00 : f32
    %56 = vector.broadcast %cst_33 : f32 to vector<8x128xf32>
    %57 = arith.addf %56, %55 : vector<8x128xf32>
    %58 = arith.mulf %20, %57 : vector<8x128xf32>
    %cst_34 = arith.constant dense<0.000000e+00> : vector<8xf32>
    %59 = vector.multi_reduction <add>, %58, %cst_34 [1] : vector<8x128xf32> to vector<8xf32>
    %60 = vector.shape_cast %59 : vector<8xf32> to vector<8x1xf32>
    %cst_35 = arith.constant 1.280000e+02 : f32
    %61 = vector.broadcast %cst_35 : f32 to vector<8x1xf32>
    %62 = arith.divf %60, %61 : vector<8x1xf32>
    %63 = vector.broadcast %62 : vector<8x1xf32> to vector<8x128xf32>
    %64 = arith.subf %58, %63 : vector<8x128xf32>
    %65 = arith.mulf %64, %64 : vector<8x128xf32>
    %cst_36 = arith.constant dense<0.000000e+00> : vector<8xf32>
    %66 = vector.multi_reduction <add>, %65, %cst_36 [1] : vector<8x128xf32> to vector<8xf32>
    %67 = vector.shape_cast %66 : vector<8xf32> to vector<8x1xf32>
    %cst_37 = arith.constant 1.280000e+02 : f32
    %68 = vector.broadcast %cst_37 : f32 to vector<8x1xf32>
    %69 = arith.divf %67, %68 : vector<8x1xf32>
    %cst_38 = arith.constant 9.99999974E-6 : f32
    %70 = vector.broadcast %cst_38 : f32 to vector<8x1xf32>
    %71 = arith.addf %69, %70 : vector<8x1xf32>
    %72 = math.rsqrt %71 : vector<8x1xf32>
    %73 = vector.broadcast %72 : vector<8x1xf32> to vector<8x128xf32>
    %74 = arith.mulf %64, %73 : vector<8x128xf32>
    %75 = vector.broadcast %16 : vector<1x128xf32> to vector<8x128xf32>
    %76 = arith.mulf %74, %75 : vector<8x128xf32>
    %77 = vector.broadcast %18 : vector<1x128xf32> to vector<8x128xf32>
    %78 = arith.addf %76, %77 : vector<8x128xf32>
    %c0_39 = arith.constant 0 : index
    %c0_40 = arith.constant 0 : index
    %c0_41 = arith.constant 0 : index
    %79 = vector.load %arg7[%c0_39, %c0_40, %c0_41] : memref<2x128x128xbf16, #tpu.memory_space<vmem>>, vector<1x128x128xbf16>
    %80 = vector.shape_cast %79 : vector<1x128x128xbf16> to vector<128x128xbf16>
    %81 = arith.extf %80 : vector<128x128xbf16> to vector<128x128xf32>
    %cst_42 = arith.constant dense<0.000000e+00> : vector<8x128xf32>
    %82 = tpu.matmul %78, %81, %cst_42 {dimension_numbers = #tpu.dot_dimension_numbers<[1], [0], [0], [1], [0, 0, 1, 1], [], []>} : vector<8x128xf32>, vector<128x128xf32>, vector<8x128xf32> -> vector<8x128xf32>
    %c0_43 = arith.constant 0 : index
    %c0_44 = arith.constant 0 : index
    %c0_45 = arith.constant 0 : index
    %83 = vector.load %arg8[%c0_43, %c0_44, %c0_45] : memref<2x1x128xf32, #tpu.memory_space<vmem>>, vector<1x1x128xf32>
    %84 = vector.shape_cast %83 : vector<1x1x128xf32> to vector<1x128xf32>
    %85 = vector.broadcast %84 : vector<1x128xf32> to vector<8x128xf32>
    %86 = arith.addf %82, %85 : vector<8x128xf32>
    %c0_46 = arith.constant 0 : index
    %c0_47 = arith.constant 0 : index
    %c0_48 = arith.constant 0 : index
    %87 = vector.load %arg9[%c0_46, %c0_47, %c0_48] : memref<2x1x128xf32, #tpu.memory_space<vmem>>, vector<1x1x128xf32>
    %88 = vector.shape_cast %87 : vector<1x1x128xf32> to vector<1x128xf32>
    %c0_49 = arith.constant 0 : index
    %c0_50 = arith.constant 0 : index
    %c0_51 = arith.constant 0 : index
    %89 = vector.load %arg10[%c0_49, %c0_50, %c0_51] : memref<2x1x128xf32, #tpu.memory_space<vmem>>, vector<1x1x128xf32>
    %90 = vector.shape_cast %89 : vector<1x1x128xf32> to vector<1x128xf32>
    %cst_52 = arith.constant 5.000000e-01 : f32
    %91 = vector.broadcast %cst_52 : f32 to vector<8x128xf32>
    %92 = arith.mulf %91, %86 : vector<8x128xf32>
    %cst_53 = arith.constant 0.707106769 : f32
    %93 = vector.broadcast %cst_53 : f32 to vector<8x128xf32>
    %94 = arith.mulf %86, %93 : vector<8x128xf32>
    %95 = math.absf %94 : vector<8x128xf32>
    %cst_54 = arith.constant 0.327591091 : f32
    %96 = vector.broadcast %cst_54 : f32 to vector<8x128xf32>
    %97 = arith.mulf %96, %95 : vector<8x128xf32>
    %cst_55 = arith.constant 1.000000e+00 : f32
    %98 = vector.broadcast %cst_55 : f32 to vector<8x128xf32>
    %99 = arith.addf %98, %97 : vector<8x128xf32>
    %cst_56 = arith.constant 1.000000e+00 : f32
    %100 = vector.broadcast %cst_56 : f32 to vector<8x128xf32>
    %101 = arith.divf %100, %99 : vector<8x128xf32>
    %cst_57 = arith.constant 1.06140542 : f32
    %102 = vector.broadcast %cst_57 : f32 to vector<8x128xf32>
    %103 = arith.mulf %102, %101 : vector<8x128xf32>
    %cst_58 = arith.constant -1.45315206 : f32
    %104 = vector.broadcast %cst_58 : f32 to vector<8x128xf32>
    %105 = arith.addf %103, %104 : vector<8x128xf32>
    %106 = arith.mulf %105, %101 : vector<8x128xf32>
    %cst_59 = arith.constant 1.42141378 : f32
    %107 = vector.broadcast %cst_59 : f32 to vector<8x128xf32>
    %108 = arith.addf %106, %107 : vector<8x128xf32>
    %109 = arith.mulf %108, %101 : vector<8x128xf32>
    %cst_60 = arith.constant -0.284496725 : f32
    %110 = vector.broadcast %cst_60 : f32 to vector<8x128xf32>
    %111 = arith.addf %109, %110 : vector<8x128xf32>
    %112 = arith.mulf %111, %101 : vector<8x128xf32>
    %cst_61 = arith.constant 0.254829586 : f32
    %113 = vector.broadcast %cst_61 : f32 to vector<8x128xf32>
    %114 = arith.addf %112, %113 : vector<8x128xf32>
    %115 = arith.mulf %114, %101 : vector<8x128xf32>
    %cst_62 = arith.constant 0.000000e+00 : f32
    %116 = vector.broadcast %cst_62 : f32 to vector<8x128xf32>
    %117 = arith.subf %116, %95 : vector<8x128xf32>
    %118 = arith.mulf %117, %95 : vector<8x128xf32>
    %119 = math.exp %118 : vector<8x128xf32>
    %120 = arith.mulf %115, %119 : vector<8x128xf32>
    %cst_63 = arith.constant 1.000000e+00 : f32
    %121 = vector.broadcast %cst_63 : f32 to vector<8x128xf32>
    %122 = arith.subf %121, %120 : vector<8x128xf32>
    %cst_64 = arith.constant 0.000000e+00 : f32
    %123 = vector.broadcast %cst_64 : f32 to vector<8x128xf32>
    %124 = arith.cmpf olt, %94, %123 : vector<8x128xf32>
    %cst_65 = arith.constant 0.000000e+00 : f32
    %125 = vector.broadcast %cst_65 : f32 to vector<8x128xf32>
    %126 = arith.subf %125, %122 : vector<8x128xf32>
    %127 = arith.select %124, %126, %122 : vector<8x128xi1>, vector<8x128xf32>
    %cst_66 = arith.constant 1.000000e+00 : f32
    %128 = vector.broadcast %cst_66 : f32 to vector<8x128xf32>
    %129 = arith.addf %128, %127 : vector<8x128xf32>
    %130 = arith.mulf %92, %129 : vector<8x128xf32>
    %cst_67 = arith.constant dense<0.000000e+00> : vector<8xf32>
    %131 = vector.multi_reduction <add>, %130, %cst_67 [1] : vector<8x128xf32> to vector<8xf32>
    %132 = vector.shape_cast %131 : vector<8xf32> to vector<8x1xf32>
    %cst_68 = arith.constant 1.280000e+02 : f32
    %133 = vector.broadcast %cst_68 : f32 to vector<8x1xf32>
    %134 = arith.divf %132, %133 : vector<8x1xf32>
    %135 = vector.broadcast %134 : vector<8x1xf32> to vector<8x128xf32>
    %136 = arith.subf %130, %135 : vector<8x128xf32>
    %137 = arith.mulf %136, %136 : vector<8x128xf32>
    %cst_69 = arith.constant dense<0.000000e+00> : vector<8xf32>
    %138 = vector.multi_reduction <add>, %137, %cst_69 [1] : vector<8x128xf32> to vector<8xf32>
    %139 = vector.shape_cast %138 : vector<8xf32> to vector<8x1xf32>
    %cst_70 = arith.constant 1.280000e+02 : f32
    %140 = vector.broadcast %cst_70 : f32 to vector<8x1xf32>
    %141 = arith.divf %139, %140 : vector<8x1xf32>
    %cst_71 = arith.constant 9.99999974E-6 : f32
    %142 = vector.broadcast %cst_71 : f32 to vector<8x1xf32>
    %143 = arith.addf %141, %142 : vector<8x1xf32>
    %144 = math.rsqrt %143 : vector<8x1xf32>
    %145 = vector.broadcast %144 : vector<8x1xf32> to vector<8x128xf32>
    %146 = arith.mulf %136, %145 : vector<8x128xf32>
    %147 = vector.broadcast %88 : vector<1x128xf32> to vector<8x128xf32>
    %148 = arith.mulf %146, %147 : vector<8x128xf32>
    %149 = vector.broadcast %90 : vector<1x128xf32> to vector<8x128xf32>
    %150 = arith.addf %148, %149 : vector<8x128xf32>
    %c0_72 = arith.constant 0 : index
    %c0_73 = arith.constant 0 : index
    %c0_74 = arith.constant 0 : index
    %151 = vector.load %arg11[%c0_72, %c0_73, %c0_74] : memref<2x128x128xbf16, #tpu.memory_space<vmem>>, vector<1x128x128xbf16>
    %152 = vector.shape_cast %151 : vector<1x128x128xbf16> to vector<128x128xbf16>
    %153 = arith.extf %152 : vector<128x128xbf16> to vector<128x128xf32>
    %cst_75 = arith.constant dense<0.000000e+00> : vector<8x128xf32>
    %154 = tpu.matmul %150, %153, %cst_75 {dimension_numbers = #tpu.dot_dimension_numbers<[1], [0], [0], [1], [0, 0, 1, 1], [], []>} : vector<8x128xf32>, vector<128x128xf32>, vector<8x128xf32> -> vector<8x128xf32>
    %c0_76 = arith.constant 0 : index
    %c0_77 = arith.constant 0 : index
    %c0_78 = arith.constant 0 : index
    %155 = vector.load %arg12[%c0_76, %c0_77, %c0_78] : memref<2x1x128xf32, #tpu.memory_space<vmem>>, vector<1x1x128xf32>
    %156 = vector.shape_cast %155 : vector<1x1x128xf32> to vector<1x128xf32>
    %157 = vector.broadcast %156 : vector<1x128xf32> to vector<8x128xf32>
    %158 = arith.addf %154, %157 : vector<8x128xf32>
    %c0_79 = arith.constant 0 : index
    %c0_80 = arith.constant 0 : index
    %c0_81 = arith.constant 0 : index
    %159 = vector.load %arg13[%c0_79, %c0_80, %c0_81] : memref<2x1x128xf32, #tpu.memory_space<vmem>>, vector<1x1x128xf32>
    %160 = vector.shape_cast %159 : vector<1x1x128xf32> to vector<1x128xf32>
    %c0_82 = arith.constant 0 : index
    %c0_83 = arith.constant 0 : index
    %c0_84 = arith.constant 0 : index
    %161 = vector.load %arg14[%c0_82, %c0_83, %c0_84] : memref<2x1x128xf32, #tpu.memory_space<vmem>>, vector<1x1x128xf32>
    %162 = vector.shape_cast %161 : vector<1x1x128xf32> to vector<1x128xf32>
    %cst_85 = arith.constant 5.000000e-01 : f32
    %163 = vector.broadcast %cst_85 : f32 to vector<8x128xf32>
    %164 = arith.mulf %163, %158 : vector<8x128xf32>
    %cst_86 = arith.constant 0.707106769 : f32
    %165 = vector.broadcast %cst_86 : f32 to vector<8x128xf32>
    %166 = arith.mulf %158, %165 : vector<8x128xf32>
    %167 = math.absf %166 : vector<8x128xf32>
    %cst_87 = arith.constant 0.327591091 : f32
    %168 = vector.broadcast %cst_87 : f32 to vector<8x128xf32>
    %169 = arith.mulf %168, %167 : vector<8x128xf32>
    %cst_88 = arith.constant 1.000000e+00 : f32
    %170 = vector.broadcast %cst_88 : f32 to vector<8x128xf32>
    %171 = arith.addf %170, %169 : vector<8x128xf32>
    %cst_89 = arith.constant 1.000000e+00 : f32
    %172 = vector.broadcast %cst_89 : f32 to vector<8x128xf32>
    %173 = arith.divf %172, %171 : vector<8x128xf32>
    %cst_90 = arith.constant 1.06140542 : f32
    %174 = vector.broadcast %cst_90 : f32 to vector<8x128xf32>
    %175 = arith.mulf %174, %173 : vector<8x128xf32>
    %cst_91 = arith.constant -1.45315206 : f32
    %176 = vector.broadcast %cst_91 : f32 to vector<8x128xf32>
    %177 = arith.addf %175, %176 : vector<8x128xf32>
    %178 = arith.mulf %177, %173 : vector<8x128xf32>
    %cst_92 = arith.constant 1.42141378 : f32
    %179 = vector.broadcast %cst_92 : f32 to vector<8x128xf32>
    %180 = arith.addf %178, %179 : vector<8x128xf32>
    %181 = arith.mulf %180, %173 : vector<8x128xf32>
    %cst_93 = arith.constant -0.284496725 : f32
    %182 = vector.broadcast %cst_93 : f32 to vector<8x128xf32>
    %183 = arith.addf %181, %182 : vector<8x128xf32>
    %184 = arith.mulf %183, %173 : vector<8x128xf32>
    %cst_94 = arith.constant 0.254829586 : f32
    %185 = vector.broadcast %cst_94 : f32 to vector<8x128xf32>
    %186 = arith.addf %184, %185 : vector<8x128xf32>
    %187 = arith.mulf %186, %173 : vector<8x128xf32>
    %cst_95 = arith.constant 0.000000e+00 : f32
    %188 = vector.broadcast %cst_95 : f32 to vector<8x128xf32>
    %189 = arith.subf %188, %167 : vector<8x128xf32>
    %190 = arith.mulf %189, %167 : vector<8x128xf32>
    %191 = math.exp %190 : vector<8x128xf32>
    %192 = arith.mulf %187, %191 : vector<8x128xf32>
    %cst_96 = arith.constant 1.000000e+00 : f32
    %193 = vector.broadcast %cst_96 : f32 to vector<8x128xf32>
    %194 = arith.subf %193, %192 : vector<8x128xf32>
    %cst_97 = arith.constant 0.000000e+00 : f32
    %195 = vector.broadcast %cst_97 : f32 to vector<8x128xf32>
    %196 = arith.cmpf olt, %166, %195 : vector<8x128xf32>
    %cst_98 = arith.constant 0.000000e+00 : f32
    %197 = vector.broadcast %cst_98 : f32 to vector<8x128xf32>
    %198 = arith.subf %197, %194 : vector<8x128xf32>
    %199 = arith.select %196, %198, %194 : vector<8x128xi1>, vector<8x128xf32>
    %cst_99 = arith.constant 1.000000e+00 : f32
    %200 = vector.broadcast %cst_99 : f32 to vector<8x128xf32>
    %201 = arith.addf %200, %199 : vector<8x128xf32>
    %202 = arith.mulf %164, %201 : vector<8x128xf32>
    %cst_100 = arith.constant dense<0.000000e+00> : vector<8xf32>
    %203 = vector.multi_reduction <add>, %202, %cst_100 [1] : vector<8x128xf32> to vector<8xf32>
    %204 = vector.shape_cast %203 : vector<8xf32> to vector<8x1xf32>
    %cst_101 = arith.constant 1.280000e+02 : f32
    %205 = vector.broadcast %cst_101 : f32 to vector<8x1xf32>
    %206 = arith.divf %204, %205 : vector<8x1xf32>
    %207 = vector.broadcast %206 : vector<8x1xf32> to vector<8x128xf32>
    %208 = arith.subf %202, %207 : vector<8x128xf32>
    %209 = arith.mulf %208, %208 : vector<8x128xf32>
    %cst_102 = arith.constant dense<0.000000e+00> : vector<8xf32>
    %210 = vector.multi_reduction <add>, %209, %cst_102 [1] : vector<8x128xf32> to vector<8xf32>
    %211 = vector.shape_cast %210 : vector<8xf32> to vector<8x1xf32>
    %cst_103 = arith.constant 1.280000e+02 : f32
    %212 = vector.broadcast %cst_103 : f32 to vector<8x1xf32>
    %213 = arith.divf %211, %212 : vector<8x1xf32>
    %cst_104 = arith.constant 9.99999974E-6 : f32
    %214 = vector.broadcast %cst_104 : f32 to vector<8x1xf32>
    %215 = arith.addf %213, %214 : vector<8x1xf32>
    %216 = math.rsqrt %215 : vector<8x1xf32>
    %217 = vector.broadcast %216 : vector<8x1xf32> to vector<8x128xf32>
    %218 = arith.mulf %208, %217 : vector<8x128xf32>
    %219 = vector.broadcast %160 : vector<1x128xf32> to vector<8x128xf32>
    %220 = arith.mulf %218, %219 : vector<8x128xf32>
    %221 = vector.broadcast %162 : vector<1x128xf32> to vector<8x128xf32>
    %222 = arith.addf %220, %221 : vector<8x128xf32>
    %c0_105 = arith.constant 0 : index
    %c0_106 = arith.constant 0 : index
    %c0_107 = arith.constant 0 : index
    %223 = vector.load %arg15[%c0_105, %c0_106, %c0_107] : memref<2x128x128xbf16, #tpu.memory_space<vmem>>, vector<1x128x128xbf16>
    %224 = vector.shape_cast %223 : vector<1x128x128xbf16> to vector<128x128xbf16>
    %225 = arith.extf %224 : vector<128x128xbf16> to vector<128x128xf32>
    %cst_108 = arith.constant dense<0.000000e+00> : vector<8x128xf32>
    %226 = tpu.matmul %222, %225, %cst_108 {dimension_numbers = #tpu.dot_dimension_numbers<[1], [0], [0], [1], [0, 0, 1, 1], [], []>} : vector<8x128xf32>, vector<128x128xf32>, vector<8x128xf32> -> vector<8x128xf32>
    %c0_109 = arith.constant 0 : index
    %c0_110 = arith.constant 0 : index
    %c0_111 = arith.constant 0 : index
    %227 = vector.load %arg16[%c0_109, %c0_110, %c0_111] : memref<2x1x128xf32, #tpu.memory_space<vmem>>, vector<1x1x128xf32>
    %228 = vector.shape_cast %227 : vector<1x1x128xf32> to vector<1x128xf32>
    %229 = vector.broadcast %228 : vector<1x128xf32> to vector<8x128xf32>
    %230 = arith.addf %226, %229 : vector<8x128xf32>
    %c0_112 = arith.constant 0 : index
    %c0_113 = arith.constant 0 : index
    %c0_114 = arith.constant 0 : index
    %231 = vector.load %arg17[%c0_112, %c0_113, %c0_114] : memref<2x1x128xf32, #tpu.memory_space<vmem>>, vector<1x1x128xf32>
    %232 = vector.shape_cast %231 : vector<1x1x128xf32> to vector<1x128xf32>
    %c0_115 = arith.constant 0 : index
    %c0_116 = arith.constant 0 : index
    %c0_117 = arith.constant 0 : index
    %233 = vector.load %arg18[%c0_115, %c0_116, %c0_117] : memref<2x1x128xf32, #tpu.memory_space<vmem>>, vector<1x1x128xf32>
    %234 = vector.shape_cast %233 : vector<1x1x128xf32> to vector<1x128xf32>
    %cst_118 = arith.constant 5.000000e-01 : f32
    %235 = vector.broadcast %cst_118 : f32 to vector<8x128xf32>
    %236 = arith.mulf %235, %230 : vector<8x128xf32>
    %cst_119 = arith.constant 0.707106769 : f32
    %237 = vector.broadcast %cst_119 : f32 to vector<8x128xf32>
    %238 = arith.mulf %230, %237 : vector<8x128xf32>
    %239 = math.absf %238 : vector<8x128xf32>
    %cst_120 = arith.constant 0.327591091 : f32
    %240 = vector.broadcast %cst_120 : f32 to vector<8x128xf32>
    %241 = arith.mulf %240, %239 : vector<8x128xf32>
    %cst_121 = arith.constant 1.000000e+00 : f32
    %242 = vector.broadcast %cst_121 : f32 to vector<8x128xf32>
    %243 = arith.addf %242, %241 : vector<8x128xf32>
    %cst_122 = arith.constant 1.000000e+00 : f32
    %244 = vector.broadcast %cst_122 : f32 to vector<8x128xf32>
    %245 = arith.divf %244, %243 : vector<8x128xf32>
    %cst_123 = arith.constant 1.06140542 : f32
    %246 = vector.broadcast %cst_123 : f32 to vector<8x128xf32>
    %247 = arith.mulf %246, %245 : vector<8x128xf32>
    %cst_124 = arith.constant -1.45315206 : f32
    %248 = vector.broadcast %cst_124 : f32 to vector<8x128xf32>
    %249 = arith.addf %247, %248 : vector<8x128xf32>
    %250 = arith.mulf %249, %245 : vector<8x128xf32>
    %cst_125 = arith.constant 1.42141378 : f32
    %251 = vector.broadcast %cst_125 : f32 to vector<8x128xf32>
    %252 = arith.addf %250, %251 : vector<8x128xf32>
    %253 = arith.mulf %252, %245 : vector<8x128xf32>
    %cst_126 = arith.constant -0.284496725 : f32
    %254 = vector.broadcast %cst_126 : f32 to vector<8x128xf32>
    %255 = arith.addf %253, %254 : vector<8x128xf32>
    %256 = arith.mulf %255, %245 : vector<8x128xf32>
    %cst_127 = arith.constant 0.254829586 : f32
    %257 = vector.broadcast %cst_127 : f32 to vector<8x128xf32>
    %258 = arith.addf %256, %257 : vector<8x128xf32>
    %259 = arith.mulf %258, %245 : vector<8x128xf32>
    %cst_128 = arith.constant 0.000000e+00 : f32
    %260 = vector.broadcast %cst_128 : f32 to vector<8x128xf32>
    %261 = arith.subf %260, %239 : vector<8x128xf32>
    %262 = arith.mulf %261, %239 : vector<8x128xf32>
    %263 = math.exp %262 : vector<8x128xf32>
    %264 = arith.mulf %259, %263 : vector<8x128xf32>
    %cst_129 = arith.constant 1.000000e+00 : f32
    %265 = vector.broadcast %cst_129 : f32 to vector<8x128xf32>
    %266 = arith.subf %265, %264 : vector<8x128xf32>
    %cst_130 = arith.constant 0.000000e+00 : f32
    %267 = vector.broadcast %cst_130 : f32 to vector<8x128xf32>
    %268 = arith.cmpf olt, %238, %267 : vector<8x128xf32>
    %cst_131 = arith.constant 0.000000e+00 : f32
    %269 = vector.broadcast %cst_131 : f32 to vector<8x128xf32>
    %270 = arith.subf %269, %266 : vector<8x128xf32>
    %271 = arith.select %268, %270, %266 : vector<8x128xi1>, vector<8x128xf32>
    %cst_132 = arith.constant 1.000000e+00 : f32
    %272 = vector.broadcast %cst_132 : f32 to vector<8x128xf32>
    %273 = arith.addf %272, %271 : vector<8x128xf32>
    %274 = arith.mulf %236, %273 : vector<8x128xf32>
    %cst_133 = arith.constant dense<0.000000e+00> : vector<8xf32>
    %275 = vector.multi_reduction <add>, %274, %cst_133 [1] : vector<8x128xf32> to vector<8xf32>
    %276 = vector.shape_cast %275 : vector<8xf32> to vector<8x1xf32>
    %cst_134 = arith.constant 1.280000e+02 : f32
    %277 = vector.broadcast %cst_134 : f32 to vector<8x1xf32>
    %278 = arith.divf %276, %277 : vector<8x1xf32>
    %279 = vector.broadcast %278 : vector<8x1xf32> to vector<8x128xf32>
    %280 = arith.subf %274, %279 : vector<8x128xf32>
    %281 = arith.mulf %280, %280 : vector<8x128xf32>
    %cst_135 = arith.constant dense<0.000000e+00> : vector<8xf32>
    %282 = vector.multi_reduction <add>, %281, %cst_135 [1] : vector<8x128xf32> to vector<8xf32>
    %283 = vector.shape_cast %282 : vector<8xf32> to vector<8x1xf32>
    %cst_136 = arith.constant 1.280000e+02 : f32
    %284 = vector.broadcast %cst_136 : f32 to vector<8x1xf32>
    %285 = arith.divf %283, %284 : vector<8x1xf32>
    %cst_137 = arith.constant 9.99999974E-6 : f32
    %286 = vector.broadcast %cst_137 : f32 to vector<8x1xf32>
    %287 = arith.addf %285, %286 : vector<8x1xf32>
    %288 = math.rsqrt %287 : vector<8x1xf32>
    %289 = vector.broadcast %288 : vector<8x1xf32> to vector<8x128xf32>
    %290 = arith.mulf %280, %289 : vector<8x128xf32>
    %291 = vector.broadcast %232 : vector<1x128xf32> to vector<8x128xf32>
    %292 = arith.mulf %290, %291 : vector<8x128xf32>
    %293 = vector.broadcast %234 : vector<1x128xf32> to vector<8x128xf32>
    %294 = arith.addf %292, %293 : vector<8x128xf32>
    %c0_138 = arith.constant 0 : index
    %c0_139 = arith.constant 0 : index
    %c0_140 = arith.constant 0 : index
    %295 = vector.load %arg19[%c0_138, %c0_139, %c0_140] : memref<2x1x128xf32, #tpu.memory_space<vmem>>, vector<1x1x128xf32>
    %296 = vector.shape_cast %295 : vector<1x1x128xf32> to vector<1x128xf32>
    %297 = vector.broadcast %296 : vector<1x128xf32> to vector<8x128xf32>
    %298 = arith.mulf %294, %297 : vector<8x128xf32>
    %cst_141 = arith.constant dense<0.000000e+00> : vector<8xf32>
    %299 = vector.multi_reduction <add>, %298, %cst_141 [1] : vector<8x128xf32> to vector<8xf32>
    %300 = vector.shape_cast %299 : vector<8xf32> to vector<8x1xf32>
    %c0_142 = arith.constant 0 : index
    %c0_143 = arith.constant 0 : index
    %c0_144 = arith.constant 0 : index
    %301 = vector.load %arg20[%c0_142, %c0_143, %c0_144] : memref<2x1x1xf32, #tpu.memory_space<vmem>>, vector<1x1x1xf32>
    %302 = vector.shape_cast %301 : vector<1x1x1xf32> to vector<1x1xf32>
    %303 = vector.broadcast %302 : vector<1x1xf32> to vector<8x1xf32>
    %304 = arith.addf %300, %303 : vector<8x1xf32>
    %c0_145 = arith.constant 0 : index
    %c0_146 = arith.constant 0 : index
    %305 = vector.load %arg21[%c0_145, %c0_146] : memref<8x2xf32, #tpu.memory_space<vmem>>, vector<8x1xf32>
    tpu.vector_store %arg21[%c0_145, %c0_146], %304 {strides = array<i32>} : memref<8x2xf32, #tpu.memory_space<vmem>>, vector<8x1xf32>,
    %c1 = arith.constant 1 : index
    %c0_147 = arith.constant 0 : index
    %c0_148 = arith.constant 0 : index
    %306 = vector.load %arg2[%c1, %c0_147, %c0_148] : memref<2x24x128xbf16, #tpu.memory_space<vmem>>, vector<1x24x128xbf16>
    %307 = vector.shape_cast %306 : vector<1x24x128xbf16> to vector<24x128xbf16>
    %308 = arith.extf %307 : vector<24x128xbf16> to vector<24x128xf32>
    %cst_149 = arith.constant dense<0.000000e+00> : vector<8x128xf32>
    %309 = tpu.matmul %0, %308, %cst_149 {dimension_numbers = #tpu.dot_dimension_numbers<[1], [0], [0], [1], [0, 0, 1, 1], [], []>} : vector<8x24xf32>, vector<24x128xf32>, vector<8x128xf32> -> vector<8x128xf32>
    %c1_150 = arith.constant 1 : index
    %c0_151 = arith.constant 0 : index
    %c0_152 = arith.constant 0 : index
    %310 = vector.load %arg3[%c1_150, %c0_151, %c0_152] : memref<2x8x128xbf16, #tpu.memory_space<vmem>>, vector<1x8x128xbf16>
    %311 = vector.shape_cast %310 : vector<1x8x128xbf16> to vector<8x128xbf16>
    %312 = arith.extf %311 : vector<8x128xbf16> to vector<8x128xf32>
    %cst_153 = arith.constant dense<0.000000e+00> : vector<8x128xf32>
    %313 = tpu.matmul %1, %312, %cst_153 {dimension_numbers = #tpu.dot_dimension_numbers<[1], [0], [0], [1], [0, 0, 1, 1], [], []>} : vector<8x8xf32>, vector<8x128xf32>, vector<8x128xf32> -> vector<8x128xf32>
    %314 = arith.addf %309, %313 : vector<8x128xf32>
    %c1_154 = arith.constant 1 : index
    %c0_155 = arith.constant 0 : index
    %c0_156 = arith.constant 0 : index
    %315 = vector.load %arg4[%c1_154, %c0_155, %c0_156] : memref<2x1x128xf32, #tpu.memory_space<vmem>>, vector<1x1x128xf32>
    %316 = vector.shape_cast %315 : vector<1x1x128xf32> to vector<1x128xf32>
    %317 = vector.broadcast %316 : vector<1x128xf32> to vector<8x128xf32>
    %318 = arith.addf %314, %317 : vector<8x128xf32>
    %c1_157 = arith.constant 1 : index
    %c0_158 = arith.constant 0 : index
    %c0_159 = arith.constant 0 : index
    %319 = vector.load %arg5[%c1_157, %c0_158, %c0_159] : memref<2x1x128xf32, #tpu.memory_space<vmem>>, vector<1x1x128xf32>
    %320 = vector.shape_cast %319 : vector<1x1x128xf32> to vector<1x128xf32>
    %c1_160 = arith.constant 1 : index
    %c0_161 = arith.constant 0 : index
    %c0_162 = arith.constant 0 : index
    %321 = vector.load %arg6[%c1_160, %c0_161, %c0_162] : memref<2x1x128xf32, #tpu.memory_space<vmem>>, vector<1x1x128xf32>
    %322 = vector.shape_cast %321 : vector<1x1x128xf32> to vector<1x128xf32>
    %cst_163 = arith.constant 5.000000e-01 : f32
    %323 = vector.broadcast %cst_163 : f32 to vector<8x128xf32>
    %324 = arith.mulf %323, %318 : vector<8x128xf32>
    %cst_164 = arith.constant 0.707106769 : f32
    %325 = vector.broadcast %cst_164 : f32 to vector<8x128xf32>
    %326 = arith.mulf %318, %325 : vector<8x128xf32>
    %327 = math.absf %326 : vector<8x128xf32>
    %cst_165 = arith.constant 0.327591091 : f32
    %328 = vector.broadcast %cst_165 : f32 to vector<8x128xf32>
    %329 = arith.mulf %328, %327 : vector<8x128xf32>
    %cst_166 = arith.constant 1.000000e+00 : f32
    %330 = vector.broadcast %cst_166 : f32 to vector<8x128xf32>
    %331 = arith.addf %330, %329 : vector<8x128xf32>
    %cst_167 = arith.constant 1.000000e+00 : f32
    %332 = vector.broadcast %cst_167 : f32 to vector<8x128xf32>
    %333 = arith.divf %332, %331 : vector<8x128xf32>
    %cst_168 = arith.constant 1.06140542 : f32
    %334 = vector.broadcast %cst_168 : f32 to vector<8x128xf32>
    %335 = arith.mulf %334, %333 : vector<8x128xf32>
    %cst_169 = arith.constant -1.45315206 : f32
    %336 = vector.broadcast %cst_169 : f32 to vector<8x128xf32>
    %337 = arith.addf %335, %336 : vector<8x128xf32>
    %338 = arith.mulf %337, %333 : vector<8x128xf32>
    %cst_170 = arith.constant 1.42141378 : f32
    %339 = vector.broadcast %cst_170 : f32 to vector<8x128xf32>
    %340 = arith.addf %338, %339 : vector<8x128xf32>
    %341 = arith.mulf %340, %333 : vector<8x128xf32>
    %cst_171 = arith.constant -0.284496725 : f32
    %342 = vector.broadcast %cst_171 : f32 to vector<8x128xf32>
    %343 = arith.addf %341, %342 : vector<8x128xf32>
    %344 = arith.mulf %343, %333 : vector<8x128xf32>
    %cst_172 = arith.constant 0.254829586 : f32
    %345 = vector.broadcast %cst_172 : f32 to vector<8x128xf32>
    %346 = arith.addf %344, %345 : vector<8x128xf32>
    %347 = arith.mulf %346, %333 : vector<8x128xf32>
    %cst_173 = arith.constant 0.000000e+00 : f32
    %348 = vector.broadcast %cst_173 : f32 to vector<8x128xf32>
    %349 = arith.subf %348, %327 : vector<8x128xf32>
    %350 = arith.mulf %349, %327 : vector<8x128xf32>
    %351 = math.exp %350 : vector<8x128xf32>
    %352 = arith.mulf %347, %351 : vector<8x128xf32>
    %cst_174 = arith.constant 1.000000e+00 : f32
    %353 = vector.broadcast %cst_174 : f32 to vector<8x128xf32>
    %354 = arith.subf %353, %352 : vector<8x128xf32>
    %cst_175 = arith.constant 0.000000e+00 : f32
    %355 = vector.broadcast %cst_175 : f32 to vector<8x128xf32>
    %356 = arith.cmpf olt, %326, %355 : vector<8x128xf32>
    %cst_176 = arith.constant 0.000000e+00 : f32
    %357 = vector.broadcast %cst_176 : f32 to vector<8x128xf32>
    %358 = arith.subf %357, %354 : vector<8x128xf32>
    %359 = arith.select %356, %358, %354 : vector<8x128xi1>, vector<8x128xf32>
    %cst_177 = arith.constant 1.000000e+00 : f32
    %360 = vector.broadcast %cst_177 : f32 to vector<8x128xf32>
    %361 = arith.addf %360, %359 : vector<8x128xf32>
    %362 = arith.mulf %324, %361 : vector<8x128xf32>
    %cst_178 = arith.constant dense<0.000000e+00> : vector<8xf32>
    %363 = vector.multi_reduction <add>, %362, %cst_178 [1] : vector<8x128xf32> to vector<8xf32>
    %364 = vector.shape_cast %363 : vector<8xf32> to vector<8x1xf32>
    %cst_179 = arith.constant 1.280000e+02 : f32
    %365 = vector.broadcast %cst_179 : f32 to vector<8x1xf32>
    %366 = arith.divf %364, %365 : vector<8x1xf32>
    %367 = vector.broadcast %366 : vector<8x1xf32> to vector<8x128xf32>
    %368 = arith.subf %362, %367 : vector<8x128xf32>
    %369 = arith.mulf %368, %368 : vector<8x128xf32>
    %cst_180 = arith.constant dense<0.000000e+00> : vector<8xf32>
    %370 = vector.multi_reduction <add>, %369, %cst_180 [1] : vector<8x128xf32> to vector<8xf32>
    %371 = vector.shape_cast %370 : vector<8xf32> to vector<8x1xf32>
    %cst_181 = arith.constant 1.280000e+02 : f32
    %372 = vector.broadcast %cst_181 : f32 to vector<8x1xf32>
    %373 = arith.divf %371, %372 : vector<8x1xf32>
    %cst_182 = arith.constant 9.99999974E-6 : f32
    %374 = vector.broadcast %cst_182 : f32 to vector<8x1xf32>
    %375 = arith.addf %373, %374 : vector<8x1xf32>
    %376 = math.rsqrt %375 : vector<8x1xf32>
    %377 = vector.broadcast %376 : vector<8x1xf32> to vector<8x128xf32>
    %378 = arith.mulf %368, %377 : vector<8x128xf32>
    %379 = vector.broadcast %320 : vector<1x128xf32> to vector<8x128xf32>
    %380 = arith.mulf %378, %379 : vector<8x128xf32>
    %381 = vector.broadcast %322 : vector<1x128xf32> to vector<8x128xf32>
    %382 = arith.addf %380, %381 : vector<8x128xf32>
    %c1_183 = arith.constant 1 : index
    %c0_184 = arith.constant 0 : index
    %c0_185 = arith.constant 0 : index
    %383 = vector.load %arg7[%c1_183, %c0_184, %c0_185] : memref<2x128x128xbf16, #tpu.memory_space<vmem>>, vector<1x128x128xbf16>
    %384 = vector.shape_cast %383 : vector<1x128x128xbf16> to vector<128x128xbf16>
    %385 = arith.extf %384 : vector<128x128xbf16> to vector<128x128xf32>
    %cst_186 = arith.constant dense<0.000000e+00> : vector<8x128xf32>
    %386 = tpu.matmul %382, %385, %cst_186 {dimension_numbers = #tpu.dot_dimension_numbers<[1], [0], [0], [1], [0, 0, 1, 1], [], []>} : vector<8x128xf32>, vector<128x128xf32>, vector<8x128xf32> -> vector<8x128xf32>
    %c1_187 = arith.constant 1 : index
    %c0_188 = arith.constant 0 : index
    %c0_189 = arith.constant 0 : index
    %387 = vector.load %arg8[%c1_187, %c0_188, %c0_189] : memref<2x1x128xf32, #tpu.memory_space<vmem>>, vector<1x1x128xf32>
    %388 = vector.shape_cast %387 : vector<1x1x128xf32> to vector<1x128xf32>
    %389 = vector.broadcast %388 : vector<1x128xf32> to vector<8x128xf32>
    %390 = arith.addf %386, %389 : vector<8x128xf32>
    %c1_190 = arith.constant 1 : index
    %c0_191 = arith.constant 0 : index
    %c0_192 = arith.constant 0 : index
    %391 = vector.load %arg9[%c1_190, %c0_191, %c0_192] : memref<2x1x128xf32, #tpu.memory_space<vmem>>, vector<1x1x128xf32>
    %392 = vector.shape_cast %391 : vector<1x1x128xf32> to vector<1x128xf32>
    %c1_193 = arith.constant 1 : index
    %c0_194 = arith.constant 0 : index
    %c0_195 = arith.constant 0 : index
    %393 = vector.load %arg10[%c1_193, %c0_194, %c0_195] : memref<2x1x128xf32, #tpu.memory_space<vmem>>, vector<1x1x128xf32>
    %394 = vector.shape_cast %393 : vector<1x1x128xf32> to vector<1x128xf32>
    %cst_196 = arith.constant 5.000000e-01 : f32
    %395 = vector.broadcast %cst_196 : f32 to vector<8x128xf32>
    %396 = arith.mulf %395, %390 : vector<8x128xf32>
    %cst_197 = arith.constant 0.707106769 : f32
    %397 = vector.broadcast %cst_197 : f32 to vector<8x128xf32>
    %398 = arith.mulf %390, %397 : vector<8x128xf32>
    %399 = math.absf %398 : vector<8x128xf32>
    %cst_198 = arith.constant 0.327591091 : f32
    %400 = vector.broadcast %cst_198 : f32 to vector<8x128xf32>
    %401 = arith.mulf %400, %399 : vector<8x128xf32>
    %cst_199 = arith.constant 1.000000e+00 : f32
    %402 = vector.broadcast %cst_199 : f32 to vector<8x128xf32>
    %403 = arith.addf %402, %401 : vector<8x128xf32>
    %cst_200 = arith.constant 1.000000e+00 : f32
    %404 = vector.broadcast %cst_200 : f32 to vector<8x128xf32>
    %405 = arith.divf %404, %403 : vector<8x128xf32>
    %cst_201 = arith.constant 1.06140542 : f32
    %406 = vector.broadcast %cst_201 : f32 to vector<8x128xf32>
    %407 = arith.mulf %406, %405 : vector<8x128xf32>
    %cst_202 = arith.constant -1.45315206 : f32
    %408 = vector.broadcast %cst_202 : f32 to vector<8x128xf32>
    %409 = arith.addf %407, %408 : vector<8x128xf32>
    %410 = arith.mulf %409, %405 : vector<8x128xf32>
    %cst_203 = arith.constant 1.42141378 : f32
    %411 = vector.broadcast %cst_203 : f32 to vector<8x128xf32>
    %412 = arith.addf %410, %411 : vector<8x128xf32>
    %413 = arith.mulf %412, %405 : vector<8x128xf32>
    %cst_204 = arith.constant -0.284496725 : f32
    %414 = vector.broadcast %cst_204 : f32 to vector<8x128xf32>
    %415 = arith.addf %413, %414 : vector<8x128xf32>
    %416 = arith.mulf %415, %405 : vector<8x128xf32>
    %cst_205 = arith.constant 0.254829586 : f32
    %417 = vector.broadcast %cst_205 : f32 to vector<8x128xf32>
    %418 = arith.addf %416, %417 : vector<8x128xf32>
    %419 = arith.mulf %418, %405 : vector<8x128xf32>
    %cst_206 = arith.constant 0.000000e+00 : f32
    %420 = vector.broadcast %cst_206 : f32 to vector<8x128xf32>
    %421 = arith.subf %420, %399 : vector<8x128xf32>
    %422 = arith.mulf %421, %399 : vector<8x128xf32>
    %423 = math.exp %422 : vector<8x128xf32>
    %424 = arith.mulf %419, %423 : vector<8x128xf32>
    %cst_207 = arith.constant 1.000000e+00 : f32
    %425 = vector.broadcast %cst_207 : f32 to vector<8x128xf32>
    %426 = arith.subf %425, %424 : vector<8x128xf32>
    %cst_208 = arith.constant 0.000000e+00 : f32
    %427 = vector.broadcast %cst_208 : f32 to vector<8x128xf32>
    %428 = arith.cmpf olt, %398, %427 : vector<8x128xf32>
    %cst_209 = arith.constant 0.000000e+00 : f32
    %429 = vector.broadcast %cst_209 : f32 to vector<8x128xf32>
    %430 = arith.subf %429, %426 : vector<8x128xf32>
    %431 = arith.select %428, %430, %426 : vector<8x128xi1>, vector<8x128xf32>
    %cst_210 = arith.constant 1.000000e+00 : f32
    %432 = vector.broadcast %cst_210 : f32 to vector<8x128xf32>
    %433 = arith.addf %432, %431 : vector<8x128xf32>
    %434 = arith.mulf %396, %433 : vector<8x128xf32>
    %cst_211 = arith.constant dense<0.000000e+00> : vector<8xf32>
    %435 = vector.multi_reduction <add>, %434, %cst_211 [1] : vector<8x128xf32> to vector<8xf32>
    %436 = vector.shape_cast %435 : vector<8xf32> to vector<8x1xf32>
    %cst_212 = arith.constant 1.280000e+02 : f32
    %437 = vector.broadcast %cst_212 : f32 to vector<8x1xf32>
    %438 = arith.divf %436, %437 : vector<8x1xf32>
    %439 = vector.broadcast %438 : vector<8x1xf32> to vector<8x128xf32>
    %440 = arith.subf %434, %439 : vector<8x128xf32>
    %441 = arith.mulf %440, %440 : vector<8x128xf32>
    %cst_213 = arith.constant dense<0.000000e+00> : vector<8xf32>
    %442 = vector.multi_reduction <add>, %441, %cst_213 [1] : vector<8x128xf32> to vector<8xf32>
    %443 = vector.shape_cast %442 : vector<8xf32> to vector<8x1xf32>
    %cst_214 = arith.constant 1.280000e+02 : f32
    %444 = vector.broadcast %cst_214 : f32 to vector<8x1xf32>
    %445 = arith.divf %443, %444 : vector<8x1xf32>
    %cst_215 = arith.constant 9.99999974E-6 : f32
    %446 = vector.broadcast %cst_215 : f32 to vector<8x1xf32>
    %447 = arith.addf %445, %446 : vector<8x1xf32>
    %448 = math.rsqrt %447 : vector<8x1xf32>
    %449 = vector.broadcast %448 : vector<8x1xf32> to vector<8x128xf32>
    %450 = arith.mulf %440, %449 : vector<8x128xf32>
    %451 = vector.broadcast %392 : vector<1x128xf32> to vector<8x128xf32>
    %452 = arith.mulf %450, %451 : vector<8x128xf32>
    %453 = vector.broadcast %394 : vector<1x128xf32> to vector<8x128xf32>
    %454 = arith.addf %452, %453 : vector<8x128xf32>
    %c1_216 = arith.constant 1 : index
    %c0_217 = arith.constant 0 : index
    %c0_218 = arith.constant 0 : index
    %455 = vector.load %arg11[%c1_216, %c0_217, %c0_218] : memref<2x128x128xbf16, #tpu.memory_space<vmem>>, vector<1x128x128xbf16>
    %456 = vector.shape_cast %455 : vector<1x128x128xbf16> to vector<128x128xbf16>
    %457 = arith.extf %456 : vector<128x128xbf16> to vector<128x128xf32>
    %cst_219 = arith.constant dense<0.000000e+00> : vector<8x128xf32>
    %458 = tpu.matmul %454, %457, %cst_219 {dimension_numbers = #tpu.dot_dimension_numbers<[1], [0], [0], [1], [0, 0, 1, 1], [], []>} : vector<8x128xf32>, vector<128x128xf32>, vector<8x128xf32> -> vector<8x128xf32>
    %c1_220 = arith.constant 1 : index
    %c0_221 = arith.constant 0 : index
    %c0_222 = arith.constant 0 : index
    %459 = vector.load %arg12[%c1_220, %c0_221, %c0_222] : memref<2x1x128xf32, #tpu.memory_space<vmem>>, vector<1x1x128xf32>
    %460 = vector.shape_cast %459 : vector<1x1x128xf32> to vector<1x128xf32>
    %461 = vector.broadcast %460 : vector<1x128xf32> to vector<8x128xf32>
    %462 = arith.addf %458, %461 : vector<8x128xf32>
    %c1_223 = arith.constant 1 : index
    %c0_224 = arith.constant 0 : index
    %c0_225 = arith.constant 0 : index
    %463 = vector.load %arg13[%c1_223, %c0_224, %c0_225] : memref<2x1x128xf32, #tpu.memory_space<vmem>>, vector<1x1x128xf32>
    %464 = vector.shape_cast %463 : vector<1x1x128xf32> to vector<1x128xf32>
    %c1_226 = arith.constant 1 : index
    %c0_227 = arith.constant 0 : index
    %c0_228 = arith.constant 0 : index
    %465 = vector.load %arg14[%c1_226, %c0_227, %c0_228] : memref<2x1x128xf32, #tpu.memory_space<vmem>>, vector<1x1x128xf32>
    %466 = vector.shape_cast %465 : vector<1x1x128xf32> to vector<1x128xf32>
    %cst_229 = arith.constant 5.000000e-01 : f32
    %467 = vector.broadcast %cst_229 : f32 to vector<8x128xf32>
    %468 = arith.mulf %467, %462 : vector<8x128xf32>
    %cst_230 = arith.constant 0.707106769 : f32
    %469 = vector.broadcast %cst_230 : f32 to vector<8x128xf32>
    %470 = arith.mulf %462, %469 : vector<8x128xf32>
    %471 = math.absf %470 : vector<8x128xf32>
    %cst_231 = arith.constant 0.327591091 : f32
    %472 = vector.broadcast %cst_231 : f32 to vector<8x128xf32>
    %473 = arith.mulf %472, %471 : vector<8x128xf32>
    %cst_232 = arith.constant 1.000000e+00 : f32
    %474 = vector.broadcast %cst_232 : f32 to vector<8x128xf32>
    %475 = arith.addf %474, %473 : vector<8x128xf32>
    %cst_233 = arith.constant 1.000000e+00 : f32
    %476 = vector.broadcast %cst_233 : f32 to vector<8x128xf32>
    %477 = arith.divf %476, %475 : vector<8x128xf32>
    %cst_234 = arith.constant 1.06140542 : f32
    %478 = vector.broadcast %cst_234 : f32 to vector<8x128xf32>
    %479 = arith.mulf %478, %477 : vector<8x128xf32>
    %cst_235 = arith.constant -1.45315206 : f32
    %480 = vector.broadcast %cst_235 : f32 to vector<8x128xf32>
    %481 = arith.addf %479, %480 : vector<8x128xf32>
    %482 = arith.mulf %481, %477 : vector<8x128xf32>
    %cst_236 = arith.constant 1.42141378 : f32
    %483 = vector.broadcast %cst_236 : f32 to vector<8x128xf32>
    %484 = arith.addf %482, %483 : vector<8x128xf32>
    %485 = arith.mulf %484, %477 : vector<8x128xf32>
    %cst_237 = arith.constant -0.284496725 : f32
    %486 = vector.broadcast %cst_237 : f32 to vector<8x128xf32>
    %487 = arith.addf %485, %486 : vector<8x128xf32>
    %488 = arith.mulf %487, %477 : vector<8x128xf32>
    %cst_238 = arith.constant 0.254829586 : f32
    %489 = vector.broadcast %cst_238 : f32 to vector<8x128xf32>
    %490 = arith.addf %488, %489 : vector<8x128xf32>
    %491 = arith.mulf %490, %477 : vector<8x128xf32>
    %cst_239 = arith.constant 0.000000e+00 : f32
    %492 = vector.broadcast %cst_239 : f32 to vector<8x128xf32>
    %493 = arith.subf %492, %471 : vector<8x128xf32>
    %494 = arith.mulf %493, %471 : vector<8x128xf32>
    %495 = math.exp %494 : vector<8x128xf32>
    %496 = arith.mulf %491, %495 : vector<8x128xf32>
    %cst_240 = arith.constant 1.000000e+00 : f32
    %497 = vector.broadcast %cst_240 : f32 to vector<8x128xf32>
    %498 = arith.subf %497, %496 : vector<8x128xf32>
    %cst_241 = arith.constant 0.000000e+00 : f32
    %499 = vector.broadcast %cst_241 : f32 to vector<8x128xf32>
    %500 = arith.cmpf olt, %470, %499 : vector<8x128xf32>
    %cst_242 = arith.constant 0.000000e+00 : f32
    %501 = vector.broadcast %cst_242 : f32 to vector<8x128xf32>
    %502 = arith.subf %501, %498 : vector<8x128xf32>
    %503 = arith.select %500, %502, %498 : vector<8x128xi1>, vector<8x128xf32>
    %cst_243 = arith.constant 1.000000e+00 : f32
    %504 = vector.broadcast %cst_243 : f32 to vector<8x128xf32>
    %505 = arith.addf %504, %503 : vector<8x128xf32>
    %506 = arith.mulf %468, %505 : vector<8x128xf32>
    %cst_244 = arith.constant dense<0.000000e+00> : vector<8xf32>
    %507 = vector.multi_reduction <add>, %506, %cst_244 [1] : vector<8x128xf32> to vector<8xf32>
    %508 = vector.shape_cast %507 : vector<8xf32> to vector<8x1xf32>
    %cst_245 = arith.constant 1.280000e+02 : f32
    %509 = vector.broadcast %cst_245 : f32 to vector<8x1xf32>
    %510 = arith.divf %508, %509 : vector<8x1xf32>
    %511 = vector.broadcast %510 : vector<8x1xf32> to vector<8x128xf32>
    %512 = arith.subf %506, %511 : vector<8x128xf32>
    %513 = arith.mulf %512, %512 : vector<8x128xf32>
    %cst_246 = arith.constant dense<0.000000e+00> : vector<8xf32>
    %514 = vector.multi_reduction <add>, %513, %cst_246 [1] : vector<8x128xf32> to vector<8xf32>
    %515 = vector.shape_cast %514 : vector<8xf32> to vector<8x1xf32>
    %cst_247 = arith.constant 1.280000e+02 : f32
    %516 = vector.broadcast %cst_247 : f32 to vector<8x1xf32>
    %517 = arith.divf %515, %516 : vector<8x1xf32>
    %cst_248 = arith.constant 9.99999974E-6 : f32
    %518 = vector.broadcast %cst_248 : f32 to vector<8x1xf32>
    %519 = arith.addf %517, %518 : vector<8x1xf32>
    %520 = math.rsqrt %519 : vector<8x1xf32>
    %521 = vector.broadcast %520 : vector<8x1xf32> to vector<8x128xf32>
    %522 = arith.mulf %512, %521 : vector<8x128xf32>
    %523 = vector.broadcast %464 : vector<1x128xf32> to vector<8x128xf32>
    %524 = arith.mulf %522, %523 : vector<8x128xf32>
    %525 = vector.broadcast %466 : vector<1x128xf32> to vector<8x128xf32>
    %526 = arith.addf %524, %525 : vector<8x128xf32>
    %c1_249 = arith.constant 1 : index
    %c0_250 = arith.constant 0 : index
    %c0_251 = arith.constant 0 : index
    %527 = vector.load %arg15[%c1_249, %c0_250, %c0_251] : memref<2x128x128xbf16, #tpu.memory_space<vmem>>, vector<1x128x128xbf16>
    %528 = vector.shape_cast %527 : vector<1x128x128xbf16> to vector<128x128xbf16>
    %529 = arith.extf %528 : vector<128x128xbf16> to vector<128x128xf32>
    %cst_252 = arith.constant dense<0.000000e+00> : vector<8x128xf32>
    %530 = tpu.matmul %526, %529, %cst_252 {dimension_numbers = #tpu.dot_dimension_numbers<[1], [0], [0], [1], [0, 0, 1, 1], [], []>} : vector<8x128xf32>, vector<128x128xf32>, vector<8x128xf32> -> vector<8x128xf32>
    %c1_253 = arith.constant 1 : index
    %c0_254 = arith.constant 0 : index
    %c0_255 = arith.constant 0 : index
    %531 = vector.load %arg16[%c1_253, %c0_254, %c0_255] : memref<2x1x128xf32, #tpu.memory_space<vmem>>, vector<1x1x128xf32>
    %532 = vector.shape_cast %531 : vector<1x1x128xf32> to vector<1x128xf32>
    %533 = vector.broadcast %532 : vector<1x128xf32> to vector<8x128xf32>
    %534 = arith.addf %530, %533 : vector<8x128xf32>
    %c1_256 = arith.constant 1 : index
    %c0_257 = arith.constant 0 : index
    %c0_258 = arith.constant 0 : index
    %535 = vector.load %arg17[%c1_256, %c0_257, %c0_258] : memref<2x1x128xf32, #tpu.memory_space<vmem>>, vector<1x1x128xf32>
    %536 = vector.shape_cast %535 : vector<1x1x128xf32> to vector<1x128xf32>
    %c1_259 = arith.constant 1 : index
    %c0_260 = arith.constant 0 : index
    %c0_261 = arith.constant 0 : index
    %537 = vector.load %arg18[%c1_259, %c0_260, %c0_261] : memref<2x1x128xf32, #tpu.memory_space<vmem>>, vector<1x1x128xf32>
    %538 = vector.shape_cast %537 : vector<1x1x128xf32> to vector<1x128xf32>
    %cst_262 = arith.constant 5.000000e-01 : f32
    %539 = vector.broadcast %cst_262 : f32 to vector<8x128xf32>
    %540 = arith.mulf %539, %534 : vector<8x128xf32>
    %cst_263 = arith.constant 0.707106769 : f32
    %541 = vector.broadcast %cst_263 : f32 to vector<8x128xf32>
    %542 = arith.mulf %534, %541 : vector<8x128xf32>
    %543 = math.absf %542 : vector<8x128xf32>
    %cst_264 = arith.constant 0.327591091 : f32
    %544 = vector.broadcast %cst_264 : f32 to vector<8x128xf32>
    %545 = arith.mulf %544, %543 : vector<8x128xf32>
    %cst_265 = arith.constant 1.000000e+00 : f32
    %546 = vector.broadcast %cst_265 : f32 to vector<8x128xf32>
    %547 = arith.addf %546, %545 : vector<8x128xf32>
    %cst_266 = arith.constant 1.000000e+00 : f32
    %548 = vector.broadcast %cst_266 : f32 to vector<8x128xf32>
    %549 = arith.divf %548, %547 : vector<8x128xf32>
    %cst_267 = arith.constant 1.06140542 : f32
    %550 = vector.broadcast %cst_267 : f32 to vector<8x128xf32>
    %551 = arith.mulf %550, %549 : vector<8x128xf32>
    %cst_268 = arith.constant -1.45315206 : f32
    %552 = vector.broadcast %cst_268 : f32 to vector<8x128xf32>
    %553 = arith.addf %551, %552 : vector<8x128xf32>
    %554 = arith.mulf %553, %549 : vector<8x128xf32>
    %cst_269 = arith.constant 1.42141378 : f32
    %555 = vector.broadcast %cst_269 : f32 to vector<8x128xf32>
    %556 = arith.addf %554, %555 : vector<8x128xf32>
    %557 = arith.mulf %556, %549 : vector<8x128xf32>
    %cst_270 = arith.constant -0.284496725 : f32
    %558 = vector.broadcast %cst_270 : f32 to vector<8x128xf32>
    %559 = arith.addf %557, %558 : vector<8x128xf32>
    %560 = arith.mulf %559, %549 : vector<8x128xf32>
    %cst_271 = arith.constant 0.254829586 : f32
    %561 = vector.broadcast %cst_271 : f32 to vector<8x128xf32>
    %562 = arith.addf %560, %561 : vector<8x128xf32>
    %563 = arith.mulf %562, %549 : vector<8x128xf32>
    %cst_272 = arith.constant 0.000000e+00 : f32
    %564 = vector.broadcast %cst_272 : f32 to vector<8x128xf32>
    %565 = arith.subf %564, %543 : vector<8x128xf32>
    %566 = arith.mulf %565, %543 : vector<8x128xf32>
    %567 = math.exp %566 : vector<8x128xf32>
    %568 = arith.mulf %563, %567 : vector<8x128xf32>
    %cst_273 = arith.constant 1.000000e+00 : f32
    %569 = vector.broadcast %cst_273 : f32 to vector<8x128xf32>
    %570 = arith.subf %569, %568 : vector<8x128xf32>
    %cst_274 = arith.constant 0.000000e+00 : f32
    %571 = vector.broadcast %cst_274 : f32 to vector<8x128xf32>
    %572 = arith.cmpf olt, %542, %571 : vector<8x128xf32>
    %cst_275 = arith.constant 0.000000e+00 : f32
    %573 = vector.broadcast %cst_275 : f32 to vector<8x128xf32>
    %574 = arith.subf %573, %570 : vector<8x128xf32>
    %575 = arith.select %572, %574, %570 : vector<8x128xi1>, vector<8x128xf32>
    %cst_276 = arith.constant 1.000000e+00 : f32
    %576 = vector.broadcast %cst_276 : f32 to vector<8x128xf32>
    %577 = arith.addf %576, %575 : vector<8x128xf32>
    %578 = arith.mulf %540, %577 : vector<8x128xf32>
    %cst_277 = arith.constant dense<0.000000e+00> : vector<8xf32>
    %579 = vector.multi_reduction <add>, %578, %cst_277 [1] : vector<8x128xf32> to vector<8xf32>
    %580 = vector.shape_cast %579 : vector<8xf32> to vector<8x1xf32>
    %cst_278 = arith.constant 1.280000e+02 : f32
    %581 = vector.broadcast %cst_278 : f32 to vector<8x1xf32>
    %582 = arith.divf %580, %581 : vector<8x1xf32>
    %583 = vector.broadcast %582 : vector<8x1xf32> to vector<8x128xf32>
    %584 = arith.subf %578, %583 : vector<8x128xf32>
    %585 = arith.mulf %584, %584 : vector<8x128xf32>
    %cst_279 = arith.constant dense<0.000000e+00> : vector<8xf32>
    %586 = vector.multi_reduction <add>, %585, %cst_279 [1] : vector<8x128xf32> to vector<8xf32>
    %587 = vector.shape_cast %586 : vector<8xf32> to vector<8x1xf32>
    %cst_280 = arith.constant 1.280000e+02 : f32
    %588 = vector.broadcast %cst_280 : f32 to vector<8x1xf32>
    %589 = arith.divf %587, %588 : vector<8x1xf32>
    %cst_281 = arith.constant 9.99999974E-6 : f32
    %590 = vector.broadcast %cst_281 : f32 to vector<8x1xf32>
    %591 = arith.addf %589, %590 : vector<8x1xf32>
    %592 = math.rsqrt %591 : vector<8x1xf32>
    %593 = vector.broadcast %592 : vector<8x1xf32> to vector<8x128xf32>
    %594 = arith.mulf %584, %593 : vector<8x128xf32>
    %595 = vector.broadcast %536 : vector<1x128xf32> to vector<8x128xf32>
    %596 = arith.mulf %594, %595 : vector<8x128xf32>
    %597 = vector.broadcast %538 : vector<1x128xf32> to vector<8x128xf32>
    %598 = arith.addf %596, %597 : vector<8x128xf32>
    %c1_282 = arith.constant 1 : index
    %c0_283 = arith.constant 0 : index
    %c0_284 = arith.constant 0 : index
    %599 = vector.load %arg19[%c1_282, %c0_283, %c0_284] : memref<2x1x128xf32, #tpu.memory_space<vmem>>, vector<1x1x128xf32>
    %600 = vector.shape_cast %599 : vector<1x1x128xf32> to vector<1x128xf32>
    %601 = vector.broadcast %600 : vector<1x128xf32> to vector<8x128xf32>
    %602 = arith.mulf %598, %601 : vector<8x128xf32>
    %cst_285 = arith.constant dense<0.000000e+00> : vector<8xf32>
    %603 = vector.multi_reduction <add>, %602, %cst_285 [1] : vector<8x128xf32> to vector<8xf32>
    %604 = vector.shape_cast %603 : vector<8xf32> to vector<8x1xf32>
    %c1_286 = arith.constant 1 : index
    %c0_287 = arith.constant 0 : index
    %c0_288 = arith.constant 0 : index
    %605 = vector.load %arg20[%c1_286, %c0_287, %c0_288] : memref<2x1x1xf32, #tpu.memory_space<vmem>>, vector<1x1x1xf32>
    %606 = vector.shape_cast %605 : vector<1x1x1xf32> to vector<1x1xf32>
    %607 = vector.broadcast %606 : vector<1x1xf32> to vector<8x1xf32>
    %608 = arith.addf %604, %607 : vector<8x1xf32>
    %c0_289 = arith.constant 0 : index
    %c1_290 = arith.constant 1 : index
    %609 = vector.load %arg21[%c0_289, %c1_290] : memref<8x2xf32, #tpu.memory_space<vmem>>, vector<8x1xf32>
    tpu.vector_store %arg21[%c0_289, %c1_290], %608 {strides = array<i32>} : memref<8x2xf32, #tpu.memory_space<vmem>>, vector<8x1xf32>,
    return
  }
}

</mosaic_0001>

<bundles_post_ra>
// kernel: critic_forward.1
= control target key start
LH: loop header
LB: loop body
LE: loop exit
PB: predicated region body
PF: predicated region fallthrough
CT: control target
= control target key end

     0   :  { %s3258_s0 = inlined_call_operand.hbm [shape: f32[8,24], index: 0, kind: input, shape index: {}]   ;;  %s3259_s1 = inlined_call_operand.hbm [shape: f32[8,8], index: 1, kind: input, shape index: {}]   ;;  %s3260_s2 = inlined_call_operand.vmem [shape: bf16[2,24,128], index: 2, kind: input, shape index: {}]   ;;  %s3261_s3 = inlined_call_operand.vmem [shape: bf16[2,8,128], index: 3, kind: input, shape index: {}]   ;;  %s3262_s4 = inlined_call_operand.hbm [shape: f32[2,1,128], index: 4, kind: input, shape index: {}]   ;;  %s3263_s5 = inlined_call_operand.hbm [shape: f32[2,1,128], index: 5, kind: input, shape index: {}]   ;;  %s3264_s6 = inlined_call_operand.hbm [shape: f32[2,1,128], index: 6, kind: input, shape index: {}]   ;;  %s3265_s7 = inlined_call_operand.hbm [shape: bf16[2,128,128], index: 7, kind: input, shape index: {}]   ;;  %s3266_s8 = inlined_call_operand.hbm [shape: f32[2,1,128], index: 8, kind: input, shape index: {}]   ;;  %s3267_s9 = inlined_call_operand.hbm [shape: f32[2,1,128], index: 9, kind: input, shape index: {}]   ;;  %s3268_s10 = inlined_call_operand.hbm [shape: f32[2,1,128], index: 10, kind: input, shape index: {}]   ;;  %s3269_s11 = inlined_call_operand.hbm [shape: bf16[2,128,128], index: 11, kind: input, shape index: {}]   ;;  %s3270_s12 = inlined_call_operand.hbm [shape: f32[2,1,128], index: 12, kind: input, shape index: {}]   ;;  %s3271_s13 = inlined_call_operand.hbm [shape: f32[2,1,128], index: 13, kind: input, shape index: {}]   ;;  %s3272_s14 = inlined_call_operand.hbm [shape: f32[2,1,128], index: 14, kind: input, shape index: {}]   ;;  %s3273_s15 = inlined_call_operand.hbm [shape: bf16[2,128,128], index: 15, kind: input, shape index: {}]   ;;  %s3274_s16 = inlined_call_operand.hbm [shape: f32[2,1,128], index: 16, kind: input, shape index: {}]   ;;  %s3275_s17 = inlined_call_operand.hbm [shape: f32[2,1,128], index: 17, kind: input, shape index: {}]   ;;  %s3276_s18 = inlined_call_operand.hbm [shape: f32[2,1,128], index: 18, kind: input, shape index: {}]   ;;  %s3277_s19 = inlined_call_operand.vmem [shape: f32[2,1,128], index: 19, kind: input, shape index: {}]   ;;  %s3278_s20 = inlined_call_operand.vmem [shape: f32[2,1,1], index: 20, kind: input, shape index: {}]   ;;  %s3279_s21 = inlined_call_operand.vmem [shape: f32[8,2], index: 21, kind: output, shape index: {}]  }
   0x1   :  { %3281 = sst [smem:[#allocation37_spill]] %s3258_s0 }
   0x2   :  { %3282 = sst [smem:[#allocation38_spill]] %s3259_s1 }
   0x3   :  { %3283 = sst [smem:[#allocation39_spill]] %s3260_s2 }
   0x4   :  { %3284 = sst [smem:[#allocation40_spill]] %s3261_s3 }
   0x5   :  { %3285 = sst [smem:[#allocation41_spill]] %s3262_s4 }
   0x6   :  { %3286 = sst [smem:[#allocation42_spill]] %s3263_s5 }
   0x7   :  { %26 = vsyncpa [#allocation3], 0 }
   0x8   :  { %27 = vsyncpa [#allocation5], 0 }
   0x9   :  { %28 = vsyncpa [#allocation8], 0 }
   0xa   :  { %29 = vsyncpa [#allocation11], 0 }
   0xb   :  { %30 = vsyncpa [#allocation14], 0 }
   0xc   :  { %31 = vsyncpa [#allocation17], 0 }
   0xd   :  { %32 = vsyncpa [#allocation20], 0 }
   0xe   :  { %33 = vsyncpa [#allocation23], 0 }
   0xf   :  { %34 = vsyncpa [#allocation26], 0  ;;  %s2841_s2 = smov [#allocation4]  }
  0x10   :  { %s51_s25 = sshll.u32 %s2841_s2, 4  ;;  %s52_s25 = int_to_ptr.vmem [resolvable:$true] %s51_s25 }
  0x11   :  { %s2491_s26 = scalar_lea.vmem %s52_s25, 128  ;;  %p2496_p1 = scmp.lt.s32.totalorder %s52_s25, %s52_s25 }
  0x12   :  { %p2492_p0 = scmp.ne.s32.totalorder %s52_s25, %s2491_s26  ;;  %p2497_p2 = scmp.lt.s32.totalorder %s2491_s26, %s2491_s26 }
  0x14   :  { %p2498_p3 = por %p2497_p2, %p2496_p1 }
  0x16   :  { %p2499_p4 = pnand %p2498_p3, %p2492_p0 }
  0x18   :  { %2502 = shalt.err (!%p2499_p4)
}
  0x19   :  { %s3287_s28 = sld [smem:[#allocation38_spill]]  ;;  %s2842_s29 = smov [#allocation7]  }
  0x1a   :  { %s76_s0 = sshll.u32 %s2842_s29, 4  ;;  %s2843_s4 = smov [#allocation10]   ;;  %s77_s0 = int_to_ptr.vmem [resolvable:$true] %s76_s0 }
  0x1b   :  { %s100_s30 = sshll.u32 %s2843_s4, 4  ;;  %s2511_s5 = scalar_lea.vmem %s77_s0, 32  ;;  %s101_s30 = int_to_ptr.vmem [resolvable:$true] %s100_s30 }
  0x1c   :  { %p2512_p5 = scmp.ne.s32.totalorder %s77_s0, %s2511_s5  ;;  %p2516_p6 = scmp.lt.s32.totalorder %s77_s0, %s77_s0 }
  0x1d   :  { %p2517_p7 = scmp.lt.s32.totalorder %s2511_s5, %s2511_s5 }
  0x1f   :  { %54 = dma.hbm_to_vmem [thread:$0]  %s3287_s28, 128, %s52_s25, [#allocation5]  }
  0x20   :  { %p2518_p8 = por %p2517_p7, %p2516_p6 }
  0x22   :  { %p2519_p9 = pnand %p2518_p8, %p2512_p5 }
  0x24   :  { %2522 = shalt.err (!%p2519_p9)
}
  0x25   :  { %s2844_s22 = smov 16   ;;  %s2845_s23 = smov 1  }
  0x26   :  { %s3288_s2 = sld [smem:[#allocation42_spill]]  ;;  %s2531_s25 = scalar_lea.vmem %s101_s30, 2048 }
  0x27   :  { %p2532_p10 = scmp.ne.s32.totalorder %s101_s30, %s2531_s25  ;;  %p2536_p11 = scmp.lt.s32.totalorder %s101_s30, %s101_s30 }
  0x28   :  { %p2537_p12 = scmp.lt.s32.totalorder %s2531_s25, %s2531_s25 }
  0x2a   :  { %p2538_p13 = por %p2537_p12, %p2536_p11 }
  0x2c   :  { %82 = dma.hbm_to_vmem [thread:$0]  %s3288_s2, 32, %s77_s0, [#allocation8], %s2844_s22, %s2844_s22, %s2845_s23  }
  0x2d   :  { %p2539_p0 = pnand %p2538_p13, %p2532_p10 }
  0x2f   :  { %2542 = shalt.err (!%p2539_p0)
}
  0x30   :  { %s2846_s26 = smov 64   ;;  %s2847_s27 = smov 4  }
  0x31   :  { %106 = dma.hbm_to_vmem [thread:$0]  %s3265_s7, 2048, %s101_s30, [#allocation11], %s2846_s26, %s2846_s26, %s2847_s27  }
  0x32   :  { %s2848_s29 = smov [#allocation13]   ;;  %s2849_s0 = smov [#allocation16]  }
  0x33   :  { %s124_s4 = sshll.u32 %s2848_s29, 4  ;;  %s148_s5 = sshll.u32 %s2849_s0, 4  ;;  %s125_s4 = int_to_ptr.vmem [resolvable:$true] %s124_s4  ;;  %s149_s5 = int_to_ptr.vmem [resolvable:$true] %s148_s5 }
  0x34   :  { %s2551_s1 = scalar_lea.vmem %s125_s4, 32  ;;  %p2556_p2 = scmp.lt.s32.totalorder %s125_s4, %s125_s4 }
  0x35   :  { %p2552_p1 = scmp.ne.s32.totalorder %s125_s4, %s2551_s1  ;;  %p2557_p3 = scmp.lt.s32.totalorder %s2551_s1, %s2551_s1 }
  0x37   :  { %p2558_p4 = por %p2557_p3, %p2556_p2 }
  0x39   :  { %p2559_p5 = pnand %p2558_p4, %p2552_p1 }
  0x3b   :  { %2562 = shalt.err (!%p2559_p5)
}
  0x3c   :  { %130 = dma.hbm_to_vmem [thread:$0]  %s3267_s9, 32, %s125_s4, [#allocation14], %s2844_s22, %s2844_s22, %s2845_s23  }
  0x3d   :  { %s2571_s7 = scalar_lea.vmem %s149_s5, 2048  ;;  %p2576_p7 = scmp.lt.s32.totalorder %s149_s5, %s149_s5 }
  0x3e   :  { %p2572_p6 = scmp.ne.s32.totalorder %s149_s5, %s2571_s7  ;;  %p2577_p8 = scmp.lt.s32.totalorder %s2571_s7, %s2571_s7 }
  0x40   :  { %p2578_p9 = por %p2577_p8, %p2576_p7 }
  0x42   :  { %p2579_p10 = pnand %p2578_p9, %p2572_p6 }
  0x44   :  { %2582 = shalt.err (!%p2579_p10)
}
  0x45   :  { %154 = dma.hbm_to_vmem [thread:$0]  %s3269_s11, 2048, %s149_s5, [#allocation17], %s2846_s26, %s2846_s26, %s2847_s27  }
  0x46   :  { %s2850_s3 = smov [#allocation19]   ;;  %s2851_s29 = smov [#allocation22]  }
  0x47   :  { %s172_s28 = sshll.u32 %s2850_s3, 4  ;;  %s196_s9 = sshll.u32 %s2851_s29, 4  ;;  %s173_s28 = int_to_ptr.vmem [resolvable:$true] %s172_s28  ;;  %s197_s9 = int_to_ptr.vmem [resolvable:$true] %s196_s9 }
  0x48   :  { %s2591_s4 = scalar_lea.vmem %s173_s28, 32  ;;  %p2596_p12 = scmp.lt.s32.totalorder %s173_s28, %s173_s28 }
  0x49   :  { %p2592_p11 = scmp.ne.s32.totalorder %s173_s28, %s2591_s4  ;;  %p2597_p13 = scmp.lt.s32.totalorder %s2591_s4, %s2591_s4 }
  0x4b   :  { %p2598_p0 = por %p2597_p13, %p2596_p12 }
  0x4d   :  { %p2599_p1 = pnand %p2598_p0, %p2592_p11 }
  0x4f   :  { %2602 = shalt.err (!%p2599_p1)
}
  0x50   :  { %178 = dma.hbm_to_vmem [thread:$0]  %s3271_s13, 32, %s173_s28, [#allocation20], %s2844_s22, %s2844_s22, %s2845_s23  }
  0x51   :  { %s2611_s11 = scalar_lea.vmem %s197_s9, 2048  ;;  %p2616_p3 = scmp.lt.s32.totalorder %s197_s9, %s197_s9 }
  0x52   :  { %p2612_p2 = scmp.ne.s32.totalorder %s197_s9, %s2611_s11  ;;  %p2617_p4 = scmp.lt.s32.totalorder %s2611_s11, %s2611_s11 }
  0x54   :  { %p2618_p5 = por %p2617_p4, %p2616_p3 }
  0x56   :  { %p2619_p6 = pnand %p2618_p5, %p2612_p2 }
  0x58   :  { %2622 = shalt.err (!%p2619_p6)
}
  0x59   :  { %202 = dma.hbm_to_vmem [thread:$0]  %s3273_s15, 2048, %s197_s9, [#allocation23], %s2846_s26, %s2846_s26, %s2847_s27  }
  0x5a   :  { %s2852_s2 = smov [#allocation25]   ;;  %s2853_s30 = smov [#allocation2]  }
  0x5b   :  { %s220_s7 = sshll.u32 %s2852_s2, 4  ;;  %s41_s13 = sshll.u32 %s2853_s30, 4  ;;  %s221_s7 = int_to_ptr.vmem [resolvable:$true] %s220_s7  ;;  %s42_s13 = int_to_ptr.vmem [resolvable:$true] %s41_s13 }
  0x5c   :  { %s2631_s25 = scalar_lea.vmem %s221_s7, 32  ;;  %p2636_p8 = scmp.lt.s32.totalorder %s221_s7, %s221_s7 }
  0x5d   :  { %p2632_p7 = scmp.ne.s32.totalorder %s221_s7, %s2631_s25  ;;  %p2637_p9 = scmp.lt.s32.totalorder %s2631_s25, %s2631_s25 }
  0x5f   :  { %p2638_p10 = por %p2637_p9, %p2636_p8 }
  0x61   :  { %p2639_p11 = pnand %p2638_p10, %p2632_p7 }
  0x63   :  { %2642 = shalt.err (!%p2639_p11)
}
  0x64   :  { %226 = dma.hbm_to_vmem [thread:$0]  %s3275_s17, 32, %s221_s7, [#allocation26], %s2844_s22, %s2844_s22, %s2845_s23  }
  0x65   :  { %s2651_s15 = scalar_lea.vmem %s42_s13, 128  ;;  %p2656_p13 = scmp.lt.s32.totalorder %s42_s13, %s42_s13 }
  0x66   :  { %p2652_p12 = scmp.ne.s32.totalorder %s42_s13, %s2651_s15  ;;  %p2657_p0 = scmp.lt.s32.totalorder %s2651_s15, %s2651_s15 }
  0x68   :  { %p2658_p1 = por %p2657_p0, %p2656_p13 }
  0x6a   :  { %p2659_p2 = pnand %p2658_p1, %p2652_p12 }
  0x6c   :  { %2662 = shalt.err (!%p2659_p2)
}
  0x6d   :  { %s3289_s29 = sld [smem:[#allocation37_spill]]  ;;  %s2854_s9 = smov [#allocation6]  }
  0x6e   :  { %s64_s4 = sshll.u32 %s2854_s9, 4  ;;  %s2855_s0 = smov [#allocation9]   ;;  %s65_s4 = int_to_ptr.vmem [resolvable:$true] %s64_s4 }
  0x6f   :  { %s88_s1 = sshll.u32 %s2855_s0, 4  ;;  %s2671_s11 = scalar_lea.vmem %s65_s4, 32  ;;  %s89_s1 = int_to_ptr.vmem [resolvable:$true] %s88_s1 }
  0x70   :  { %p2672_p3 = scmp.ne.s32.totalorder %s65_s4, %s2671_s11  ;;  %p2676_p4 = scmp.lt.s32.totalorder %s65_s4, %s65_s4 }
  0x71   :  { %p2677_p5 = scmp.lt.s32.totalorder %s2671_s11, %s2671_s11 }
  0x73   :  { %44 = dma.hbm_to_vmem [thread:$0]  %s3289_s29, 128, %s42_s13, [#allocation3]  }
  0x74   :  { %p2678_p6 = por %p2677_p5, %p2676_p4 }
  0x76   :  { %p2679_p7 = pnand %p2678_p6, %p2672_p3 }
  0x78   :  { %2682 = shalt.err (!%p2679_p7)
}
  0x79   :  { %s3290_s24 = sld [smem:[#allocation41_spill]]  ;;  %s2691_s2 = scalar_lea.vmem %s89_s1, 32 }
  0x7a   :  { %p2692_p8 = scmp.ne.s32.totalorder %s89_s1, %s2691_s2  ;;  %p2696_p9 = scmp.lt.s32.totalorder %s89_s1, %s89_s1 }
  0x7b   :  { %p2697_p10 = scmp.lt.s32.totalorder %s2691_s2, %s2691_s2 }
  0x7d   :  { %p2698_p11 = por %p2697_p10, %p2696_p9 }
  0x7f   :  { %70 = dma.hbm_to_vmem [thread:$0]  %s3290_s24, 32, %s65_s4, [#allocation5], %s2844_s22, %s2844_s22, %s2845_s23  }
  0x80   :  { %p2699_p12 = pnand %p2698_p11, %p2692_p8 }
  0x82   :  { %2702 = shalt.err (!%p2699_p12)
}
  0x83   :  { %94 = dma.hbm_to_vmem [thread:$0]  %s3264_s6, 32, %s89_s1, [#allocation8], %s2844_s22, %s2844_s22, %s2845_s23  }
  0x84   :  { %s2856_s13 = smov [#allocation12]   ;;  %s2857_s3 = smov [#allocation15]  }
  0x85   :  { %s112_s25 = sshll.u32 %s2856_s13, 4  ;;  %s136_s28 = sshll.u32 %s2857_s3, 4  ;;  %s113_s25 = int_to_ptr.vmem [resolvable:$true] %s112_s25  ;;  %s137_s28 = int_to_ptr.vmem [resolvable:$true] %s136_s28 }
  0x86   :  { %s2711_s15 = scalar_lea.vmem %s113_s25, 32  ;;  %p2716_p0 = scmp.lt.s32.totalorder %s113_s25, %s113_s25 }
  0x87   :  { %p2712_p13 = scmp.ne.s32.totalorder %s113_s25, %s2711_s15  ;;  %p2717_p1 = scmp.lt.s32.totalorder %s2711_s15, %s2711_s15 }
  0x89   :  { %p2718_p2 = por %p2717_p1, %p2716_p0 }
  0x8b   :  { %p2719_p3 = pnand %p2718_p2, %p2712_p13 }
  0x8d   :  { %2722 = shalt.err (!%p2719_p3)
}
  0x8e   :  { %118 = dma.hbm_to_vmem [thread:$0]  %s3266_s8, 32, %s113_s25, [#allocation11], %s2844_s22, %s2844_s22, %s2845_s23  }
  0x8f   :  { %s2731_s6 = scalar_lea.vmem %s137_s28, 32  ;;  %p2736_p5 = scmp.lt.s32.totalorder %s137_s28, %s137_s28 }
  0x90   :  { %p2732_p4 = scmp.ne.s32.totalorder %s137_s28, %s2731_s6  ;;  %p2737_p6 = scmp.lt.s32.totalorder %s2731_s6, %s2731_s6 }
  0x92   :  { %p2738_p7 = por %p2737_p6, %p2736_p5 }
  0x94   :  { %p2739_p8 = pnand %p2738_p7, %p2732_p4 }
  0x96   :  { %2742 = shalt.err (!%p2739_p8)
}
  0x97   :  { %142 = dma.hbm_to_vmem [thread:$0]  %s3268_s10, 32, %s137_s28, [#allocation14], %s2844_s22, %s2844_s22, %s2845_s23  }
  0x98   :  { %s2858_s4 = smov [#allocation18]   ;;  %s2859_s1 = smov [#allocation21]  }
  0x99   :  { %s160_s0 = sshll.u32 %s2858_s4, 4  ;;  %s184_s8 = sshll.u32 %s2859_s1, 4  ;;  %s161_s0 = int_to_ptr.vmem [resolvable:$true] %s160_s0  ;;  %s185_s8 = int_to_ptr.vmem [resolvable:$true] %s184_s8 }
  0x9a   :  { %s2751_s11 = scalar_lea.vmem %s161_s0, 32  ;;  %p2756_p10 = scmp.lt.s32.totalorder %s161_s0, %s161_s0 }
  0x9b   :  { %p2752_p9 = scmp.ne.s32.totalorder %s161_s0, %s2751_s11  ;;  %p2757_p11 = scmp.lt.s32.totalorder %s2751_s11, %s2751_s11 }
  0x9d   :  { %p2758_p12 = por %p2757_p11, %p2756_p10 }
  0x9f   :  { %p2759_p13 = pnand %p2758_p12, %p2752_p9 }
  0xa1   :  { %2762 = shalt.err (!%p2759_p13)
}
  0xa2   :  { %166 = dma.hbm_to_vmem [thread:$0]  %s3270_s12, 32, %s161_s0, [#allocation17], %s2844_s22, %s2844_s22, %s2845_s23  }
  0xa3   :  { %s2771_s10 = scalar_lea.vmem %s185_s8, 32  ;;  %p2776_p1 = scmp.lt.s32.totalorder %s185_s8, %s185_s8 }
  0xa4   :  { %p2772_p0 = scmp.ne.s32.totalorder %s185_s8, %s2771_s10  ;;  %p2777_p2 = scmp.lt.s32.totalorder %s2771_s10, %s2771_s10 }
  0xa6   :  { %p2778_p3 = por %p2777_p2, %p2776_p1 }
  0xa8   :  { %p2779_p4 = pnand %p2778_p3, %p2772_p0 }
  0xaa   :  { %2782 = shalt.err (!%p2779_p4)
}
  0xab   :  { %190 = dma.hbm_to_vmem [thread:$0]  %s3272_s14, 32, %s185_s8, [#allocation20], %s2844_s22, %s2844_s22, %s2845_s23  }
  0xac   :  { %s2860_s7 = smov [#allocation24]   ;;  %s2861_s13 = smov [#allocation27]  }
  0xad   :  { %s208_s30 = sshll.u32 %s2860_s7, 4  ;;  %s232_s12 = sshll.u32 %s2861_s13, 4  ;;  %s209_s30 = int_to_ptr.vmem [resolvable:$true] %s208_s30  ;;  %s233_s12 = int_to_ptr.vmem [resolvable:$true] %s232_s12 }
  0xae   :  { %s2791_s25 = scalar_lea.vmem %s209_s30, 32  ;;  %p2796_p6 = scmp.lt.s32.totalorder %s209_s30, %s209_s30 }
  0xaf   :  { %p2792_p5 = scmp.ne.s32.totalorder %s209_s30, %s2791_s25  ;;  %p2797_p7 = scmp.lt.s32.totalorder %s2791_s25, %s2791_s25 }
  0xb1   :  { %p2798_p8 = por %p2797_p7, %p2796_p6 }
  0xb3   :  { %p2799_p9 = pnand %p2798_p8, %p2792_p5 }
  0xb5   :  { %2802 = shalt.err (!%p2799_p9)
}
  0xb6   :  { %214 = dma.hbm_to_vmem [thread:$0]  %s3274_s16, 32, %s209_s30, [#allocation23], %s2844_s22, %s2844_s22, %s2845_s23  }
  0xb7   :  { %s2811_s14 = scalar_lea.vmem %s233_s12, 32  ;;  %p2816_p11 = scmp.lt.s32.totalorder %s233_s12, %s233_s12 }
  0xb8   :  { %p2812_p10 = scmp.ne.s32.totalorder %s233_s12, %s2811_s14  ;;  %p2817_p12 = scmp.lt.s32.totalorder %s2811_s14, %s2811_s14 }
  0xba   :  { %p2818_p13 = por %p2817_p12, %p2816_p11 }
  0xbc   :  { %p2819_p0 = pnand %p2818_p13, %p2812_p10 }
  0xbe   :  { %2822 = shalt.err (!%p2819_p0)
}
  0xbf   :  { %238 = dma.hbm_to_vmem [thread:$0]  %s3276_s18, 32, %s233_s12, [#allocation26], %s2844_s22, %s2844_s22, %s2845_s23  }
  0xc0   :  { %2823 = dma.done.wait [#allocation3], 128  }
  0xc1   :  { %2824 = vsyncadd [#allocation3], 4294967168 }
  0xc2   :  { %2825 = dma.done.wait [#allocation5], 160  }
  0xc3   :  { %2826 = vsyncadd [#allocation5], 4294967136 }
  0xc4   :  { %2827 = dma.done.wait [#allocation8], 64  }
  0xc5   :  { %2828 = vsyncadd [#allocation8], 4294967232 }
  0xc6   :  { %2829 = dma.done.wait [#allocation11], 2080  }
  0xc7   :  { %2830 = vsyncadd [#allocation11], 4294965216 }
  0xc8   :  { %2831 = dma.done.wait [#allocation14], 64  }
  0xc9   :  { %2832 = vsyncadd [#allocation14], 4294967232 }
  0xca   :  { %2833 = dma.done.wait [#allocation17], 2080  }
  0xcb   :  { %2834 = vsyncadd [#allocation17], 4294965216 }
  0xcc   :  { %2835 = dma.done.wait [#allocation20], 64  }
  0xcd   :  { %2836 = vsyncadd [#allocation20], 4294967232 }
  0xce   :  { %2837 = dma.done.wait [#allocation23], 2080  }
  0xcf   :  { %2838 = vsyncadd [#allocation23], 4294965216 }
  0xd0   :  { %2839 = dma.done.wait [#allocation26], 64  }
  0xd1   :  { %2840 = vsyncadd [#allocation26], 4294967232  ;;  %v2862_v0 = vmov 0.0   ;;  %vm2863_vm0 = vmmov 0   ;;  %s3291_s22 = sld [smem:[#allocation40_spill]]  ;;  %v3087_v4 = vld [vmem:[#allocation4] sm:$0xff] }
  0xd2   :  { %2174 = vmatprep.subr.mxu0 %v2862_v0  ;;  %2176 = vmatprep.mubr.msk.f32.mxu0 %vm2863_vm0, %v2862_v0  ;;  %s3292_s29 = sld [smem:[#allocation39_spill]]  ;;  %vm304_vm1 = vcmask 64512   ;;  %v3099_v9 = vld [vmem:[#allocation2] sm:$0xff]  ;;  %vm378_vm2 = vcmask 195584   ;;  %v1781_v13 = vld [vmem:[#allocation6] ss:$0 sm:$0xff] }
  0xd3   :  { %2223 = vmatprep.subr.mxu1 %v2862_v0  ;;  %2255 = vmatprep.mubr.msk.f32.mxu1 %vm2863_vm0, %v2862_v0  ;;  %v2023_v42 = vld [vmem:[#allocation10 + $0x38] sm:$0xff]   ;;  %v2022_v43 = vld [vmem:[#allocation10 + $0x30] sm:$0xff]   ;;  %v2021_v52 = vld [vmem:[#allocation10 + $0x28] sm:$0xff]   ;;  %vm1022_vm11 = vcmask 7168   ;;  %vm1764_vm12 = vcmask 15368  }
  0xd4   :  { %v1852_v44 = vunpack.c.h.bf16 %v2023_v42  ;;  %v1851_v45 = vunpack.c.l.bf16 %v2023_v42  ;;  %v1848_v46 = vunpack.c.h.bf16 %v2022_v43  ;;  %v1847_v47 = vunpack.c.l.bf16 %v2022_v43  ;;  %v2020_v55 = vld [vmem:[#allocation10 + $0x20] sm:$0xff]   ;;  %v2019_v58 = vld [vmem:[#allocation10 + $0x18] sm:$0xff]   ;;  %v2018_v60 = vld [vmem:[#allocation10 + $0x10] sm:$0xff]  }
  0xd5   :  { %v1844_v53 = vunpack.c.h.bf16 %v2021_v52  ;;  %v1843_v54 = vunpack.c.l.bf16 %v2021_v52  ;;  %v1840_v56 = vunpack.c.h.bf16 %v2020_v55  ;;  %v1839_v57 = vunpack.c.l.bf16 %v2020_v55  ;;  %v2017_v63 = vld [vmem:[#allocation10 + $0x8] sm:$0xff]  }
  0xd6   :  { %v1836_v59 = vunpack.c.h.bf16 %v2019_v58  ;;  %v1835_v61 = vunpack.c.l.bf16 %v2019_v58  ;;  %v1832_v62 = vunpack.c.h.bf16 %v2018_v60 }
  0xd7   :  { %v3079_v1 = vld [vmem:[%s3291_s22] sm:$0xff]  }
  0xd8   :  { %v3084_v2 = vld [vmem:[%s3292_s29 + $0x8] sm:$0xff]   ;;  %v303_v3 = vunpack.c.l.bf16 %v3079_v1  ;;  %v1818_v6 = vld [vmem:[%s3292_s29] sm:$0xff]  }
  0xd9   :  { %v301_v5 = vunpack.c.l.bf16 %v3084_v2  ;;  %v1820_v7 = vunpack.c.h.bf16 %v1818_v6  ;;  %v1819_v8 = vunpack.c.l.bf16 %v1818_v6  ;;  %v1822_v6 = vld [vmem:[#allocation10] sm:$0xff]  }
  0xda   :  { %2175 = vmatpush3.msra.mxu0 %v303_v3  ;;  %v1831_v3 = vunpack.c.l.bf16 %v2018_v60 }
  0xdb   :  { %2177 = vmatmul.mubr.msk.f32.vlgmr.msra.gmra.mxu0 %vm304_vm1, %v3087_v4  ;;  %2179 = vmatprep.subr.mxu0 %v2862_v0 }
  0xdc   :  { %2180 = vmatpush3.msra.mxu0 %v301_v5  ;;  %2185 = vmatprep.mubr.msk.f32.mxu0 %vm2863_vm0, %v2862_v0  ;;  %v1828_v5 = vunpack.c.h.bf16 %v2017_v63 }
  0xdd   :  { %2181 = vmatprep.subr.mxu0 %v2862_v0 }
  0xde   :  { %2182 = vmatpush3.msra.mxu0 %v1820_v7  ;;  %v1827_v7 = vunpack.c.l.bf16 %v2017_v63 }
  0xdf   :  { %2183 = vmatprep.subr.mxu0 %v2862_v0 }
  0xe0   :  { %2184 = vmatpush3.msra.mxu0 %v1819_v8  ;;  %v1824_v8 = vunpack.c.h.bf16 %v1822_v6 }
  0xe1   :  { %2186 = vmatmul.mubr.msk.f32.vlgmr.msra.gmra.mxu0 %vm378_vm2, %v3099_v9  ;;  %2188 = vmatprep.subr.mxu0 %v2862_v0 }
  0xe2   :  { %2220 = vmatprep.mubr.msk.f32.mxu0 %vm2863_vm0, %v2862_v0  ;;  %2189 = vmatpush3.msra.mxu0 %v1852_v44 }
  0xe3   :  { %2190 = vmatprep.subr.mxu0 %v2862_v0 }
  0xe4   :  { %2191 = vmatpush3.msra.mxu0 %v1851_v45 }
  0xe5   :  { %2192 = vmatprep.subr.mxu0 %v2862_v0 }
  0xe6   :  { %2193 = vmatpush3.msra.mxu0 %v1848_v46 }
  0xe7   :  { %2194 = vmatprep.subr.mxu0 %v2862_v0 }
  0xe8   :  { %2195 = vmatpush3.msra.mxu0 %v1847_v47 }
  0xe9   :  { %2196 = vmatprep.subr.mxu0 %v2862_v0 }
  0xea   :  { %2197 = vmatpush3.msra.mxu0 %v1844_v53 }
  0xeb   :  { %2198 = vmatprep.subr.mxu0 %v2862_v0 }
  0xec   :  { %2199 = vmatpush3.msra.mxu0 %v1843_v54 }
  0xed   :  { %2200 = vmatprep.subr.mxu0 %v2862_v0 }
  0xee   :  { %2201 = vmatpush3.msra.mxu0 %v1840_v56 }
  0xef   :  { %2202 = vmatprep.subr.mxu0 %v2862_v0 }
  0xf0   :  { %2203 = vmatpush3.msra.mxu0 %v1839_v57 }
  0xf1   :  { %2204 = vmatprep.subr.mxu0 %v2862_v0 }
  0xf2   :  { %2205 = vmatpush3.msra.mxu0 %v1836_v59  ;;  %v2028_v59 = vld [vmem:[#allocation16 + $0x28] sm:$0xff]  }
  0xf3   :  { %2206 = vmatprep.subr.mxu0 %v2862_v0  ;;  %v1876_v60 = vunpack.c.h.bf16 %v2028_v59 }
  0xf4   :  { %2207 = vmatpush3.msra.mxu0 %v1835_v61  ;;  %v1875_v61 = vunpack.c.l.bf16 %v2028_v59 }
  0xf5   :  { %2208 = vmatprep.subr.mxu0 %v2862_v0 }
  0xf6   :  { %2209 = vmatpush3.msra.mxu0 %v1832_v62  ;;  %v2027_v62 = vld [vmem:[#allocation16 + $0x20] sm:$0xff]  }
  0xf7   :  { %2210 = vmatprep.subr.mxu0 %v2862_v0  ;;  %v1872_v63 = vunpack.c.h.bf16 %v2027_v62 }
  0xf8   :  { %2211 = vmatpush3.msra.mxu0 %v1831_v3  ;;  %v1871_v3 = vunpack.c.l.bf16 %v2027_v62 }
  0xf9   :  { %2212 = vmatprep.subr.mxu0 %v2862_v0 }
  0xfa   :  { %2213 = vmatpush3.msra.mxu0 %v1828_v5  ;;  %v2026_v5 = vld [vmem:[#allocation16 + $0x18] sm:$0xff]  }
  0xfb   :  { %2214 = vmatprep.subr.mxu0 %v2862_v0 }
  0xfc   :  { %2215 = vmatpush3.msra.mxu0 %v1827_v7  ;;  %v2025_v7 = vld [vmem:[#allocation16 + $0x10] sm:$0xff]  }
  0xfd   :  { %2216 = vmatprep.subr.mxu0 %v2862_v0 }
  0xfe   :  { %2217 = vmatpush3.msra.mxu0 %v1824_v8  ;;  %v1867_v8 = vunpack.c.l.bf16 %v2026_v5 }
  0xff   :  { %2218 = vmatprep.subr.mxu0 %v2862_v0 }
 0x19b   :  { %v374_v10 = vpop.f32.mrf.mxu0 }
 0x19d   :  { %v2178_v11 = vpop.f32.mrf.mxu0 }
 0x1a1   :  { %v448_v12 = vpop.f32.mrf.mxu0 }
 0x1a2   :  { %v449_v14 = vadd.f32 %v448_v12, %v374_v10  ;;  %v1823_v10 = vunpack.c.l.bf16 %v1822_v6  ;;  %v1868_v6 = vunpack.c.h.bf16 %v2026_v5 }
 0x1a3   :  { %v2187_v15 = vpop.f32.mrf.mxu0 }
 0x1a4   :  { %v459_v16 = vadd.f32 %v1781_v13, %v449_v14  ;;  %2219 = vmatpush3.msra.mxu0 %v1823_v10  ;;  %v1782_v15 = vld [vmem:[#allocation7] ss:$0 sm:$0xff]  ;;  %v1864_v10 = vunpack.c.h.bf16 %v2025_v7 }
 0x1a5   :  { %2258 = vmatprep.subr.mxu0 %v2862_v0 }
 0x1a6   :  { %v463_v17 = vmul.f32 0.70710677, %v459_v16  ;;  %v462_v39 = vmul.f32 0.5, %v459_v16 }
 0x1a8   :  { %v464_v18 = vand.u32 2147483647, %v463_v17  ;;  %vm484_vm3 = vcmp.lt.f32.partialorder %v463_v17, 0.0  ;;  %v1783_v17 = vld [vmem:[#allocation9] ss:$0 sm:$0xff] }
 0x1aa   :  { %v465_v19 = vmul.f32 0.3275911, %v464_v18  ;;  %v478_v21 = vsub.f32 0.0, %v464_v18 }
 0x1ac   :  { %v466_v20 = vadd.f32 1.0, %v465_v19  ;;  %v479_v22 = vmul.f32 %v478_v21, %v464_v18 }
 0x1ae   :  { %2435 = vrcp.f32 %v466_v20  ;;  %v480_v24 = vmul.f32 1.442695, %v479_v22  ;;  %v1784_v20 = vld [vmem:[#allocation12] ss:$0 sm:$0xff] }
 0x1b0   :  { %2437 = vpow2.f32 %v480_v24 }
 0x1bb   :  { %v2436_v23 = vpop.eup %2435 }
 0x1bc   :  { %v469_v25 = vmul.f32 1.0614054, %v2436_v23 }
 0x1bd   :  { %v2438_v34 = vpop.eup %2437 }
 0x1be   :  { %v470_v26 = vadd.f32 -1.4531521, %v469_v25 }
 0x1c0   :  { %v471_v27 = vmul.f32 %v2436_v23, %v470_v26 }
 0x1c2   :  { %v472_v28 = vadd.f32 1.4214138, %v471_v27 }
 0x1c4   :  { %v473_v29 = vmul.f32 %v2436_v23, %v472_v28 }
 0x1c6   :  { %v474_v30 = vadd.f32 -0.28449672, %v473_v29 }
 0x1c8   :  { %v475_v31 = vmul.f32 %v2436_v23, %v474_v30 }
 0x1ca   :  { %v476_v32 = vadd.f32 0.2548296, %v475_v31 }
 0x1cc   :  { %v477_v33 = vmul.f32 %v2436_v23, %v476_v32 }
 0x1ce   :  { %v482_v35 = vmul.f32 %v2438_v34, %v477_v33 }
 0x1d0   :  { %v483_v36 = vsub.f32 1.0, %v482_v35 }
 0x1d2   :  { %v485_v37 = vsub.f32 0.0, %v483_v36 }
 0x1d4   :  { %v486_v38 = vsel %vm484_vm3, %v485_v37, %v483_v36 }
 0x1d5   :  { %v487_v40 = vadd.f32 1.0, %v486_v38 }
 0x1d7   :  { %v488_v41 = vmul.f32 %v487_v40, %v462_v39 }
 0x1d9   :  { %489 = vadd.xlane.f32.xlu0 %v488_v41 }
 0x262   :  { %v490_v48 = vpop.xlane.xlu0 %489 }
 0x263   :  { %v492_v49 = vmul.f32 0.0078125, %v490_v48 }
 0x265   :  { %v493_v50 = vsub.f32 %v488_v41, %v492_v49  ;;  %v2030_v49 = vld [vmem:[#allocation16 + $0x38] sm:$0xff]  }
 0x266   :  { %v1884_v52 = vunpack.c.h.bf16 %v2030_v49 }
 0x267   :  { %v494_v51 = vmul.f32 %v493_v50, %v493_v50 }
 0x268   :  { %2224 = vmatpush3.msra.mxu1 %v1884_v52 }
 0x269   :  { %495 = vadd.xlane.f32.xlu0 %v494_v51  ;;  %v1883_v51 = vunpack.c.l.bf16 %v2030_v49  ;;  %2225 = vmatprep.subr.mxu1 %v2862_v0 }
 0x26b   :  { %2226 = vmatpush3.msra.mxu1 %v1883_v51 }
 0x26c   :  { %2227 = vmatprep.subr.mxu1 %v2862_v0 }
 0x2f2   :  { %v496_v11 = vpop.xlane.xlu0 %495 }
 0x2f3   :  { %v497_v12 = vmul.f32 0.0078125, %v496_v11  ;;  %v2024_v11 = vld [vmem:[#allocation16 + $0x8] sm:$0xff]  }
 0x2f5   :  { %v498_v13 = vadd.f32 1e-05, %v497_v12  ;;  %v1863_v12 = vunpack.c.l.bf16 %v2025_v7 }
 0x2f7   :  { %2439 = vrsqrt.f32 %v498_v13  ;;  %v1860_v13 = vunpack.c.h.bf16 %v2024_v11 }
 0x304   :  { %v2440_v14 = vpop.eup %2439 }
 0x305   :  { %v500_v16 = vmul.f32 %v2440_v14, %v493_v50  ;;  %v2029_v50 = vld [vmem:[#allocation16 + $0x30] sm:$0xff]   ;;  %v1854_v14 = vld [vmem:[#allocation16] sm:$0xff]  }
 0x306   :  { %v1880_v53 = vunpack.c.h.bf16 %v2029_v50  ;;  %v1879_v54 = vunpack.c.l.bf16 %v2029_v50 }
 0x307   :  { %v507_v18 = vmul.f32 %v1782_v15, %v500_v16  ;;  %v1859_v15 = vunpack.c.l.bf16 %v2024_v11  ;;  %v1856_v16 = vunpack.c.h.bf16 %v1854_v14 }
 0x308   :  { %2228 = vmatpush3.msra.mxu1 %v1880_v53 }
 0x309   :  { %v514_v19 = vadd.f32 %v1783_v17, %v507_v18  ;;  %2229 = vmatprep.subr.mxu1 %v2862_v0  ;;  %v1855_v17 = vunpack.c.l.bf16 %v1854_v14 }
 0x30a   :  { %2230 = vmatpush3.msra.mxu1 %v1879_v54 }
 0x30b   :  { %2221 = vmatmul.mubr.f32.vlgmr.msra.gmra.mxu0 %v514_v19  ;;  %2231 = vmatprep.subr.mxu1 %v2862_v0 }
 0x30c   :  { %2290 = vmatprep.mubr.msk.f32.mxu0 %vm2863_vm0, %v2862_v0  ;;  %2232 = vmatpush3.msra.mxu1 %v1876_v60 }
 0x30d   :  { %2233 = vmatprep.subr.mxu1 %v2862_v0 }
 0x30e   :  { %2234 = vmatpush3.msra.mxu1 %v1875_v61 }
 0x30f   :  { %2235 = vmatprep.subr.mxu1 %v2862_v0 }
 0x310   :  { %2236 = vmatpush3.msra.mxu1 %v1872_v63 }
 0x311   :  { %2237 = vmatprep.subr.mxu1 %v2862_v0 }
 0x312   :  { %2238 = vmatpush3.msra.mxu1 %v1871_v3 }
 0x313   :  { %2239 = vmatprep.subr.mxu1 %v2862_v0 }
 0x314   :  { %2240 = vmatpush3.msra.mxu1 %v1868_v6 }
 0x315   :  { %2241 = vmatprep.subr.mxu1 %v2862_v0 }
 0x316   :  { %2242 = vmatpush3.msra.mxu1 %v1867_v8 }
 0x317   :  { %2243 = vmatprep.subr.mxu1 %v2862_v0 }
 0x318   :  { %2244 = vmatpush3.msra.mxu1 %v1864_v10 }
 0x319   :  { %2245 = vmatprep.subr.mxu1 %v2862_v0 }
 0x31a   :  { %2246 = vmatpush3.msra.mxu1 %v1863_v12 }
 0x31b   :  { %2247 = vmatprep.subr.mxu1 %v2862_v0 }
 0x31c   :  { %2248 = vmatpush3.msra.mxu1 %v1860_v13 }
 0x31d   :  { %2249 = vmatprep.subr.mxu1 %v2862_v0 }
 0x31e   :  { %2250 = vmatpush3.msra.mxu1 %v1859_v15 }
 0x31f   :  { %2251 = vmatprep.subr.mxu1 %v2862_v0 }
 0x320   :  { %2252 = vmatpush3.msra.mxu1 %v1856_v16 }
 0x321   :  { %2253 = vmatprep.subr.mxu1 %v2862_v0 }
 0x322   :  { %2254 = vmatpush3.msra.mxu1 %v1855_v17 }
 0x323   :  { %2293 = vmatprep.subr.mxu1 %v2862_v0 }
 0x3cb   :  { %v620_v21 = vpop.f32.mrf.mxu0 }
 0x3cc   :  { %v621_v22 = vadd.f32 %v1784_v20, %v620_v21 }
 0x3cd   :  { %v2222_v23 = vpop.f32.mrf.mxu0 }
 0x3ce   :  { %v627_v24 = vmul.f32 0.70710677, %v621_v22  ;;  %v626_v46 = vmul.f32 0.5, %v621_v22  ;;  %v1785_v22 = vld [vmem:[#allocation13] ss:$0 sm:$0xff] }
 0x3d0   :  { %v628_v25 = vand.u32 2147483647, %v627_v24  ;;  %vm648_vm4 = vcmp.lt.f32.partialorder %v627_v24, 0.0  ;;  %v1786_v24 = vld [vmem:[#allocation15] ss:$0 sm:$0xff] }
 0x3d2   :  { %v629_v26 = vmul.f32 0.3275911, %v628_v25  ;;  %v642_v28 = vsub.f32 0.0, %v628_v25 }
 0x3d4   :  { %v630_v27 = vadd.f32 1.0, %v629_v26  ;;  %v643_v29 = vmul.f32 %v642_v28, %v628_v25  ;;  %v1033_v26 = vunpack.c.h.bf16 %v3079_v1  ;;  %v2038_v28 = vld [vmem:[%s3292_s29 + $0x10] sm:$0xff]   ;;  %v1028_v1 = vunpack.c.h.bf16 %v3084_v2 }
 0x3d6   :  { %2441 = vrcp.f32 %v630_v27  ;;  %v644_v31 = vmul.f32 1.442695, %v643_v29  ;;  %v1920_v29 = vunpack.c.h.bf16 %v2038_v28 }
 0x3d8   :  { %2443 = vpow2.f32 %v644_v31 }
 0x3e3   :  { %v2442_v30 = vpop.eup %2441 }
 0x3e4   :  { %v633_v32 = vmul.f32 1.0614054, %v2442_v30 }
 0x3e5   :  { %v2444_v41 = vpop.eup %2443 }
 0x3e6   :  { %v634_v33 = vadd.f32 -1.4531521, %v633_v32 }
 0x3e8   :  { %v635_v34 = vmul.f32 %v2442_v30, %v634_v33 }
 0x3ea   :  { %v636_v35 = vadd.f32 1.4214138, %v635_v34 }
 0x3ec   :  { %v637_v36 = vmul.f32 %v2442_v30, %v636_v35 }
 0x3ee   :  { %v638_v37 = vadd.f32 -0.28449672, %v637_v36 }
 0x3f0   :  { %v639_v38 = vmul.f32 %v2442_v30, %v638_v37 }
 0x3f2   :  { %v640_v39 = vadd.f32 0.2548296, %v639_v38 }
 0x3f4   :  { %v641_v40 = vmul.f32 %v2442_v30, %v640_v39  ;;  %v1919_v30 = vunpack.c.l.bf16 %v2038_v28 }
 0x3f6   :  { %v646_v42 = vmul.f32 %v2444_v41, %v641_v40  ;;  %v1801_v40 = vld [vmem:[#allocation6 + $0x1] ss:$0 sm:$0xff] }
 0x3f8   :  { %v647_v43 = vsub.f32 1.0, %v646_v42 }
 0x3fa   :  { %v649_v44 = vsub.f32 0.0, %v647_v43 }
 0x3fc   :  { %v650_v45 = vsel %vm648_vm4, %v649_v44, %v647_v43 }
 0x3fd   :  { %v651_v47 = vadd.f32 1.0, %v650_v45 }
 0x3ff   :  { %v652_v48 = vmul.f32 %v651_v47, %v626_v46 }
 0x401   :  { %653 = vadd.xlane.f32.xlu1 %v652_v48 }
 0x48a   :  { %v654_v55 = vpop.xlane.xlu1 %653 }
 0x48b   :  { %v655_v56 = vmul.f32 0.0078125, %v654_v55 }
 0x48d   :  { %v656_v57 = vsub.f32 %v652_v48, %v655_v56 }
 0x48f   :  { %v657_v58 = vmul.f32 %v656_v57, %v656_v57 }
 0x491   :  { %658 = vadd.xlane.f32.xlu1 %v657_v58 }
 0x51a   :  { %v659_v18 = vpop.xlane.xlu1 %658 }
 0x51b   :  { %v660_v19 = vmul.f32 0.0078125, %v659_v18 }
 0x51d   :  { %v661_v20 = vadd.f32 1e-05, %v660_v19 }
 0x51f   :  { %2445 = vrsqrt.f32 %v661_v20 }
 0x52c   :  { %v2446_v21 = vpop.eup %2445 }
 0x52d   :  { %v663_v23 = vmul.f32 %v2446_v21, %v656_v57 }
 0x52f   :  { %v670_v25 = vmul.f32 %v1785_v22, %v663_v23 }
 0x531   :  { %v677_v27 = vadd.f32 %v1786_v24, %v670_v25 }
 0x533   :  { %2256 = vmatmul.mubr.f32.vlgmr.msra.gmra.mxu1 %v677_v27 }
 0x534   :  { %2294 = vmatpush3.msra.mxu1 %v1033_v26  ;;  %2295 = vmatprep.mubr.msk.f32.mxu1 %vm2863_vm0, %v2862_v0 }
 0x535   :  { %2298 = vmatprep.subr.mxu1 %v2862_v0 }
 0x537   :  { %2296 = vmatmul.mubr.msk.f32.vlgmr.msra.gmra.mxu1 %vm304_vm1, %v3087_v4  ;;  %v1787_v4 = vld [vmem:[#allocation18] ss:$0 sm:$0xff] }
 0x538   :  { %2299 = vmatpush3.msra.mxu1 %v1920_v29  ;;  %2304 = vmatprep.mubr.msk.f32.mxu1 %vm2863_vm0, %v2862_v0 }
 0x539   :  { %2300 = vmatprep.subr.mxu1 %v2862_v0 }
 0x53a   :  { %2301 = vmatpush3.msra.mxu1 %v1919_v30  ;;  %v2045_v30 = vld [vmem:[#allocation10 + $0x78] sm:$0xff]  }
 0x53b   :  { %2302 = vmatprep.subr.mxu1 %v2862_v0 }
 0x53c   :  { %2303 = vmatpush3.msra.mxu1 %v1028_v1  ;;  %v2037_v1 = vld [vmem:[#allocation22 + $0x38] sm:$0xff]  }
 0x53d   :  { %2305 = vmatmul.mubr.msk.f32.vlgmr.msra.gmra.mxu1 %vm378_vm2, %v3099_v9  ;;  %2307 = vmatprep.subr.mxu1 %v2862_v0 }
 0x53e   :  { %2339 = vmatprep.mubr.msk.f32.mxu1 %vm2863_vm0, %v2862_v0 }
 0x5f3   :  { %v783_v31 = vpop.f32.mrf.mxu1 }
 0x5f4   :  { %v784_v2 = vadd.f32 %v1787_v4, %v783_v31  ;;  %v2044_v4 = vld [vmem:[#allocation10 + $0x70] sm:$0xff]   ;;  %v1952_v31 = vunpack.c.h.bf16 %v2045_v30 }
 0x5f5   :  { %v2257_v32 = vpop.f32.mrf.mxu1 }
 0x5f6   :  { %v790_v33 = vmul.f32 0.70710677, %v784_v2  ;;  %v789_v28 = vmul.f32 0.5, %v784_v2  ;;  %v1951_v32 = vunpack.c.l.bf16 %v2045_v30  ;;  %2308 = vmatpush3.msra.mxu1 %v1952_v31  ;;  %v1947_v2 = vunpack.c.l.bf16 %v2044_v4  ;;  %v1802_v30 = vld [vmem:[#allocation7 + $0x1] ss:$0 sm:$0xff] }
 0x5f7   :  { %v1100_v34 = vpop.f32.mrf.mxu1  ;;  %2309 = vmatprep.subr.mxu1 %v2862_v0 }
 0x5f8   :  { %v791_v35 = vand.u32 2147483647, %v790_v33  ;;  %vm811_vm5 = vcmp.lt.f32.partialorder %v790_v33, 0.0  ;;  %v1948_v33 = vunpack.c.h.bf16 %v2044_v4  ;;  %2310 = vmatpush3.msra.mxu1 %v1951_v32  ;;  %v1803_v4 = vld [vmem:[#allocation9 + $0x1] ss:$0 sm:$0xff] }
 0x5f9   :  { %v2297_v36 = vpop.f32.mrf.mxu1  ;;  %2311 = vmatprep.subr.mxu1 %v2862_v0 }
 0x5fa   :  { %v792_v37 = vmul.f32 0.3275911, %v791_v35  ;;  %v805_v47 = vsub.f32 0.0, %v791_v35  ;;  %2312 = vmatpush3.msra.mxu1 %v1948_v33 }
 0x5fb   :  { %2313 = vmatprep.subr.mxu1 %v2862_v0 }
 0x5fc   :  { %v793_v38 = vadd.f32 1.0, %v792_v37  ;;  %v806_v50 = vmul.f32 %v805_v47, %v791_v35  ;;  %v1915_v35 = vunpack.c.l.bf16 %v2037_v1  ;;  %2314 = vmatpush3.msra.mxu1 %v1947_v2  ;;  %v1789_v2 = vld [vmem:[#allocation21] ss:$0 sm:$0xff] }
 0x5fd   :  { %v1170_v39 = vpop.f32.mrf.mxu1  ;;  %2315 = vmatprep.subr.mxu1 %v2862_v0 }
 0x5fe   :  { %2447 = vrcp.f32 %v793_v38  ;;  %v1171_v41 = vadd.f32 %v1170_v39, %v1100_v34  ;;  %v807_v54 = vmul.f32 1.442695, %v806_v50  ;;  %v1916_v34 = vunpack.c.h.bf16 %v2037_v1  ;;  %v2042_v50 = vld [vmem:[#allocation10 + $0x60] sm:$0xff]  }
 0x5ff   :  { %v2306_v9 = vpop.f32.mrf.mxu1 }
 0x600   :  { %v1182_v42 = vadd.f32 %v1801_v40, %v1171_v41  ;;  %2259 = vmatpush3.msra.mxu0 %v1916_v34  ;;  %v1788_v34 = vld [vmem:[#allocation19] ss:$0 sm:$0xff] }
 0x601   :  { %2260 = vmatprep.subr.mxu0 %v2862_v0 }
 0x602   :  { %v1188_v43 = vmul.f32 0.70710677, %v1182_v42  ;;  %v1187_v24 = vmul.f32 0.5, %v1182_v42  ;;  %2261 = vmatpush3.msra.mxu0 %v1915_v35 }
 0x603   :  { %2262 = vmatprep.subr.mxu0 %v2862_v0 }
 0x604   :  { %v1189_v44 = vand.u32 2147483647, %v1188_v43  ;;  %vm1209_vm6 = vcmp.lt.f32.partialorder %v1188_v43, 0.0  ;;  %v2036_v43 = vld [vmem:[#allocation22 + $0x30] sm:$0xff]  }
 0x605   :  { %v1911_v47 = vunpack.c.l.bf16 %v2036_v43 }
 0x606   :  { %v1190_v45 = vmul.f32 0.3275911, %v1189_v44  ;;  %v1203_v52 = vsub.f32 0.0, %v1189_v44 }
 0x608   :  { %v1191_v46 = vadd.f32 1.0, %v1190_v45  ;;  %v1204_v56 = vmul.f32 %v1203_v52, %v1189_v44  ;;  %v2043_v44 = vld [vmem:[#allocation10 + $0x68] sm:$0xff]   ;;  %v1912_v45 = vunpack.c.h.bf16 %v2036_v43  ;;  %v1940_v52 = vunpack.c.h.bf16 %v2042_v50 }
 0x60a   :  { %2449 = vrcp.f32 %v1191_v46  ;;  %v1205_v60 = vmul.f32 1.442695, %v1204_v56  ;;  %v1944_v46 = vunpack.c.h.bf16 %v2043_v44  ;;  %2263 = vmatpush3.msra.mxu0 %v1912_v45  ;;  %v2041_v56 = vld [vmem:[#allocation10 + $0x58] sm:$0xff]  }
 0x60b   :  { %v2448_v48 = vpop.eup %2447  ;;  %2451 = vpow2.f32 %v807_v54  ;;  %2264 = vmatprep.subr.mxu0 %v2862_v0  ;;  %v1939_v54 = vunpack.c.l.bf16 %v2042_v50 }
 0x60c   :  { %v796_v49 = vmul.f32 1.0614054, %v2448_v48  ;;  %2453 = vpow2.f32 %v1205_v60  ;;  %2316 = vmatpush3.msra.mxu1 %v1944_v46  ;;  %2265 = vmatpush3.msra.mxu0 %v1911_v47  ;;  %v1935_v60 = vunpack.c.l.bf16 %v2041_v56 }
 0x60d   :  { %2317 = vmatprep.subr.mxu1 %v2862_v0  ;;  %2266 = vmatprep.subr.mxu0 %v2862_v0 }
 0x60e   :  { %v797_v51 = vadd.f32 -1.4531521, %v796_v49  ;;  %v2035_v49 = vld [vmem:[#allocation22 + $0x28] sm:$0xff]  }
 0x610   :  { %v798_v53 = vmul.f32 %v2448_v48, %v797_v51  ;;  %v1908_v51 = vunpack.c.h.bf16 %v2035_v49 }
 0x612   :  { %v799_v55 = vadd.f32 1.4214138, %v798_v53  ;;  %2267 = vmatpush3.msra.mxu0 %v1908_v51  ;;  %v1907_v53 = vunpack.c.l.bf16 %v2035_v49 }
 0x613   :  { %2268 = vmatprep.subr.mxu0 %v2862_v0 }
 0x614   :  { %v800_v57 = vmul.f32 %v2448_v48, %v799_v55  ;;  %v2034_v55 = vld [vmem:[#allocation22 + $0x20] sm:$0xff]   ;;  %2269 = vmatpush3.msra.mxu0 %v1907_v53 }
 0x615   :  { %2270 = vmatprep.subr.mxu0 %v2862_v0 }
 0x616   :  { %v801_v58 = vadd.f32 -0.28449672, %v800_v57  ;;  %v1904_v57 = vunpack.c.h.bf16 %v2034_v55 }
 0x617   :  { %v2450_v59 = vpop.eup %2449 }
 0x618   :  { %v1194_v61 = vmul.f32 1.0614054, %v2450_v59  ;;  %v802_v62 = vmul.f32 %v2448_v48, %v801_v58  ;;  %v2452_v11 = vpop.eup %2451  ;;  %v1936_v58 = vunpack.c.h.bf16 %v2041_v56  ;;  %2271 = vmatpush3.msra.mxu0 %v1904_v57 }
 0x619   :  { %v2454_v17 = vpop.eup %2453  ;;  %2272 = vmatprep.subr.mxu0 %v2862_v0 }
 0x61a   :  { %v1195_v63 = vadd.f32 -1.4531521, %v1194_v61  ;;  %v803_v5 = vadd.f32 0.2548296, %v802_v62  ;;  %v2033_v61 = vld [vmem:[#allocation22 + $0x18] sm:$0xff]   ;;  %v2040_v62 = vld [vmem:[#allocation10 + $0x50] sm:$0xff]  }
 0x61c   :  { %v1196_v3 = vmul.f32 %v2450_v59, %v1195_v63  ;;  %v804_v8 = vmul.f32 %v2448_v48, %v803_v5  ;;  %v1943_v48 = vunpack.c.l.bf16 %v2043_v44  ;;  %v1900_v63 = vunpack.c.h.bf16 %v2033_v61  ;;  %v2032_v5 = vld [vmem:[#allocation22 + $0x10] sm:$0xff]  }
 0x61e   :  { %v1197_v6 = vadd.f32 1.4214138, %v1196_v3  ;;  %v809_v13 = vmul.f32 %v2452_v11, %v804_v8  ;;  %2318 = vmatpush3.msra.mxu1 %v1943_v48  ;;  %v1932_v3 = vunpack.c.h.bf16 %v2040_v62  ;;  %v1931_v8 = vunpack.c.l.bf16 %v2040_v62 }
 0x61f   :  { %2319 = vmatprep.subr.mxu1 %v2862_v0 }
 0x620   :  { %v1198_v7 = vmul.f32 %v2450_v59, %v1197_v6  ;;  %v810_v16 = vsub.f32 1.0, %v809_v13  ;;  %2320 = vmatpush3.msra.mxu1 %v1940_v52  ;;  %v2039_v6 = vld [vmem:[#allocation10 + $0x48] sm:$0xff]   ;;  %v1922_v13 = vld [vmem:[#allocation10 + $0x40] sm:$0xff]  }
 0x621   :  { %2321 = vmatprep.subr.mxu1 %v2862_v0  ;;  %v1928_v11 = vunpack.c.h.bf16 %v2039_v6 }
 0x622   :  { %v1199_v10 = vadd.f32 -0.28449672, %v1198_v7  ;;  %v812_v20 = vsub.f32 0.0, %v810_v16  ;;  %2322 = vmatpush3.msra.mxu1 %v1939_v54  ;;  %v1899_v7 = vunpack.c.l.bf16 %v2033_v61 }
 0x623   :  { %2323 = vmatprep.subr.mxu1 %v2862_v0 }
 0x624   :  { %v1200_v12 = vmul.f32 %v2450_v59, %v1199_v10  ;;  %v813_v23 = vsel %vm811_vm5, %v812_v20, %v810_v16  ;;  %2324 = vmatpush3.msra.mxu1 %v1936_v58  ;;  %v1896_v10 = vunpack.c.h.bf16 %v2032_v5  ;;  %v1886_v20 = vld [vmem:[#allocation22] sm:$0xff]  }
 0x625   :  { %v814_v27 = vadd.f32 1.0, %v813_v23  ;;  %2325 = vmatprep.subr.mxu1 %v2862_v0 }
 0x626   :  { %v1201_v14 = vadd.f32 0.2548296, %v1200_v12  ;;  %2326 = vmatpush3.msra.mxu1 %v1935_v60  ;;  %v2031_v12 = vld [vmem:[#allocation22 + $0x8] sm:$0xff]  }
 0x627   :  { %v815_v29 = vmul.f32 %v814_v27, %v789_v28  ;;  %2327 = vmatprep.subr.mxu1 %v2862_v0  ;;  %v1892_v16 = vunpack.c.h.bf16 %v2031_v12 }
 0x628   :  { %v1202_v15 = vmul.f32 %v2450_v59, %v1201_v14  ;;  %v1903_v59 = vunpack.c.l.bf16 %v2034_v55  ;;  %2328 = vmatpush3.msra.mxu1 %v1932_v3  ;;  %v1895_v14 = vunpack.c.l.bf16 %v2032_v5 }
 0x629   :  { %2329 = vmatprep.subr.mxu1 %v2862_v0 }
 0x62a   :  { %v1207_v18 = vmul.f32 %v2454_v17, %v1202_v15  ;;  %2273 = vmatpush3.msra.mxu0 %v1903_v59  ;;  %2330 = vmatpush3.msra.mxu1 %v1931_v8  ;;  %v1927_v15 = vunpack.c.l.bf16 %v2039_v6  ;;  %v1924_v17 = vunpack.c.h.bf16 %v1922_v13  ;;  %v2052_v8 = vld [vmem:[#allocation16 + $0x78] sm:$0xff]  }
 0x62b   :  { %2274 = vmatprep.subr.mxu0 %v2862_v0  ;;  %2331 = vmatprep.subr.mxu1 %v2862_v0 }
 0x62c   :  { %v1208_v19 = vsub.f32 1.0, %v1207_v18  ;;  %2275 = vmatpush3.msra.mxu0 %v1900_v63  ;;  %2332 = vmatpush3.msra.mxu1 %v1928_v11  ;;  %v1891_v18 = vunpack.c.l.bf16 %v2031_v12  ;;  %v1984_v11 = vunpack.c.h.bf16 %v2052_v8  ;;  %v1983_v12 = vunpack.c.l.bf16 %v2052_v8 }
 0x62d   :  { %2276 = vmatprep.subr.mxu0 %v2862_v0  ;;  %2333 = vmatprep.subr.mxu1 %v2862_v0 }
 0x62e   :  { %v1210_v21 = vsub.f32 0.0, %v1208_v19  ;;  %2277 = vmatpush3.msra.mxu0 %v1899_v7  ;;  %2334 = vmatpush3.msra.mxu1 %v1927_v15 }
 0x62f   :  { %2278 = vmatprep.subr.mxu0 %v2862_v0  ;;  %2335 = vmatprep.subr.mxu1 %v2862_v0 }
 0x630   :  { %v1211_v22 = vsel %vm1209_vm6, %v1210_v21, %v1208_v19  ;;  %2279 = vmatpush3.msra.mxu0 %v1896_v10  ;;  %v1923_v19 = vunpack.c.l.bf16 %v1922_v13  ;;  %2336 = vmatpush3.msra.mxu1 %v1924_v17  ;;  %v1888_v21 = vunpack.c.h.bf16 %v1886_v20  ;;  %v2051_v10 = vld [vmem:[#allocation16 + $0x70] sm:$0xff]  }
 0x631   :  { %v1212_v25 = vadd.f32 1.0, %v1211_v22  ;;  %2280 = vmatprep.subr.mxu0 %v2862_v0  ;;  %2337 = vmatprep.subr.mxu1 %v2862_v0  ;;  %v1887_v22 = vunpack.c.l.bf16 %v1886_v20  ;;  %v1980_v13 = vunpack.c.h.bf16 %v2051_v10 }
 0x632   :  { %2281 = vmatpush3.msra.mxu0 %v1895_v14  ;;  %2338 = vmatpush3.msra.mxu1 %v1923_v19  ;;  %v1979_v14 = vunpack.c.l.bf16 %v2051_v10  ;;  %v2050_v19 = vld [vmem:[#allocation16 + $0x68] sm:$0xff]  }
 0x633   :  { %v1213_v26 = vmul.f32 %v1212_v25, %v1187_v24  ;;  %2282 = vmatprep.subr.mxu0 %v2862_v0  ;;  %2377 = vmatprep.subr.mxu1 %v2862_v0  ;;  %v1976_v20 = vunpack.c.h.bf16 %v2050_v19 }
 0x634   :  { %2283 = vmatpush3.msra.mxu0 %v1892_v16 }
 0x635   :  { %1214 = vadd.xlane.f32.xlu0 %v1213_v26  ;;  %2284 = vmatprep.subr.mxu0 %v2862_v0 }
 0x636   :  { %2285 = vmatpush3.msra.mxu0 %v1891_v18 }
 0x637   :  { %2286 = vmatprep.subr.mxu0 %v2862_v0 }
 0x638   :  { %2287 = vmatpush3.msra.mxu0 %v1888_v21  ;;  %v1975_v21 = vunpack.c.l.bf16 %v2050_v19  ;;  %v1790_v19 = vld [vmem:[#allocation24] ss:$0 sm:$0xff] }
 0x639   :  { %816 = vadd.xlane.f32.xlu0 %v815_v29  ;;  %2288 = vmatprep.subr.mxu0 %v2862_v0 }
 0x63a   :  { %2289 = vmatpush3.msra.mxu0 %v1887_v22  ;;  %v2049_v22 = vld [vmem:[#allocation16 + $0x60] sm:$0xff]  }
 0x63b   :  { %2342 = vmatprep.subr.mxu0 %v2862_v0 }
 0x6be   :  { %v1215_v36 = vpop.xlane.xlu0 %1214 }
 0x6bf   :  { %v1216_v37 = vmul.f32 0.0078125, %v1215_v36 }
 0x6c1   :  { %v3166_v38 = vsub.f32 %v1213_v26, %v1216_v37 }
 0x6c2   :  { %v817_v39 = vpop.xlane.xlu0 %816 }
 0x6c3   :  { %v818_v40 = vmul.f32 0.0078125, %v817_v39  ;;  %v1218_v41 = vmul.f32 %v3166_v38, %v3166_v38  ;;  %v1804_v39 = vld [vmem:[#allocation12 + $0x1] ss:$0 sm:$0xff] }
 0x6c5   :  { %v3170_v9 = vsub.f32 %v815_v29, %v818_v40  ;;  %1219 = vadd.xlane.f32.xlu1 %v1218_v41 }
 0x6c7   :  { %v820_v42 = vmul.f32 %v3170_v9, %v3170_v9 }
 0x6c9   :  { %821 = vadd.xlane.f32.xlu0 %v820_v42 }
 0x74e   :  { %v1220_v23 = vpop.xlane.xlu1 %1219 }
 0x74f   :  { %v1221_v24 = vmul.f32 0.0078125, %v1220_v23  ;;  %v1972_v23 = vunpack.c.h.bf16 %v2049_v22 }
 0x751   :  { %v1222_v25 = vadd.f32 1e-05, %v1221_v24  ;;  %v1971_v24 = vunpack.c.l.bf16 %v2049_v22 }
 0x752   :  { %v822_v26 = vpop.xlane.xlu0 %821 }
 0x753   :  { %2455 = vrsqrt.f32 %v1222_v25  ;;  %v823_v27 = vmul.f32 0.0078125, %v822_v26  ;;  %v2048_v25 = vld [vmem:[#allocation16 + $0x58] sm:$0xff]  }
 0x754   :  { %v1968_v26 = vunpack.c.h.bf16 %v2048_v25 }
 0x755   :  { %v824_v28 = vadd.f32 1e-05, %v823_v27  ;;  %v2047_v27 = vld [vmem:[#allocation16 + $0x50] sm:$0xff]  }
 0x757   :  { %2457 = vrsqrt.f32 %v824_v28  ;;  %v1967_v28 = vunpack.c.l.bf16 %v2048_v25 }
 0x760   :  { %v2456_v29 = vpop.eup %2455 }
 0x761   :  { %v1224_v1 = vmul.f32 %v2456_v29, %v3166_v38  ;;  %v1964_v29 = vunpack.c.h.bf16 %v2047_v27 }
 0x763   :  { %v1231_v31 = vmul.f32 %v1802_v30, %v1224_v1  ;;  %v2046_v30 = vld [vmem:[#allocation16 + $0x48] sm:$0xff]   ;;  %v1963_v1 = vunpack.c.l.bf16 %v2047_v27 }
 0x764   :  { %v2458_v32 = vpop.eup %2457 }
 0x765   :  { %v1238_v35 = vadd.f32 %v1803_v4, %v1231_v31  ;;  %v826_v33 = vmul.f32 %v2458_v32, %v3170_v9  ;;  %v1960_v4 = vunpack.c.h.bf16 %v2046_v30  ;;  %v1954_v31 = vld [vmem:[#allocation16 + $0x40] sm:$0xff]   ;;  %v1959_v32 = vunpack.c.l.bf16 %v2046_v30 }
 0x767   :  { %2340 = vmatmul.mubr.f32.vlgmr.msra.gmra.mxu1 %v1238_v35  ;;  %v833_v36 = vmul.f32 %v1788_v34, %v826_v33  ;;  %v1956_v34 = vunpack.c.h.bf16 %v1954_v31  ;;  %v1955_v35 = vunpack.c.l.bf16 %v1954_v31 }
 0x768   :  { %2409 = vmatprep.mubr.msk.f32.mxu1 %vm2863_vm0, %v2862_v0 }
 0x769   :  { %v840_v37 = vadd.f32 %v1789_v2, %v833_v36 }
 0x76b   :  { %2291 = vmatmul.mubr.f32.vlgmr.msra.gmra.mxu0 %v840_v37 }
 0x76c   :  { %2374 = vmatprep.mubr.msk.f32.mxu0 %vm2863_vm0, %v2862_v0  ;;  %2343 = vmatpush3.msra.mxu0 %v1984_v11 }
 0x76d   :  { %2344 = vmatprep.subr.mxu0 %v2862_v0 }
 0x76e   :  { %2345 = vmatpush3.msra.mxu0 %v1983_v12 }
 0x76f   :  { %2346 = vmatprep.subr.mxu0 %v2862_v0 }
 0x770   :  { %2347 = vmatpush3.msra.mxu0 %v1980_v13  ;;  %v2059_v13 = vld [vmem:[#allocation22 + $0x78] sm:$0xff]  }
 0x771   :  { %2348 = vmatprep.subr.mxu0 %v2862_v0 }
 0x772   :  { %2349 = vmatpush3.msra.mxu0 %v1979_v14  ;;  %v2058_v14 = vld [vmem:[#allocation22 + $0x70] sm:$0xff]  }
 0x773   :  { %2350 = vmatprep.subr.mxu0 %v2862_v0 }
 0x774   :  { %2351 = vmatpush3.msra.mxu0 %v1976_v20 }
 0x775   :  { %2352 = vmatprep.subr.mxu0 %v2862_v0 }
 0x776   :  { %2353 = vmatpush3.msra.mxu0 %v1975_v21 }
 0x777   :  { %2354 = vmatprep.subr.mxu0 %v2862_v0 }
 0x778   :  { %2355 = vmatpush3.msra.mxu0 %v1972_v23 }
 0x779   :  { %2356 = vmatprep.subr.mxu0 %v2862_v0 }
 0x77a   :  { %2357 = vmatpush3.msra.mxu0 %v1971_v24 }
 0x77b   :  { %2358 = vmatprep.subr.mxu0 %v2862_v0 }
 0x77c   :  { %2359 = vmatpush3.msra.mxu0 %v1968_v26 }
 0x77d   :  { %2360 = vmatprep.subr.mxu0 %v2862_v0 }
 0x77e   :  { %2361 = vmatpush3.msra.mxu0 %v1967_v28 }
 0x77f   :  { %2362 = vmatprep.subr.mxu0 %v2862_v0 }
 0x780   :  { %2363 = vmatpush3.msra.mxu0 %v1964_v29 }
 0x781   :  { %2364 = vmatprep.subr.mxu0 %v2862_v0 }
 0x782   :  { %2365 = vmatpush3.msra.mxu0 %v1963_v1 }
 0x783   :  { %2366 = vmatprep.subr.mxu0 %v2862_v0 }
 0x784   :  { %2367 = vmatpush3.msra.mxu0 %v1960_v4 }
 0x785   :  { %2368 = vmatprep.subr.mxu0 %v2862_v0 }
 0x786   :  { %2369 = vmatpush3.msra.mxu0 %v1959_v32 }
 0x787   :  { %2370 = vmatprep.subr.mxu0 %v2862_v0 }
 0x788   :  { %2371 = vmatpush3.msra.mxu0 %v1956_v34 }
 0x789   :  { %2372 = vmatprep.subr.mxu0 %v2862_v0 }
 0x78a   :  { %2373 = vmatpush3.msra.mxu0 %v1955_v35 }
 0x827   :  { %v1346_v38 = vpop.f32.mrf.mxu1 }
 0x828   :  { %v1347_v40 = vadd.f32 %v1804_v39, %v1346_v38  ;;  %v1805_v39 = vld [vmem:[#allocation13 + $0x1] ss:$0 sm:$0xff] }
 0x829   :  { %v2341_v41 = vpop.f32.mrf.mxu1 }
 0x82a   :  { %v1355_v42 = vmul.f32 0.70710677, %v1347_v40  ;;  %v1354_v5 = vmul.f32 0.5, %v1347_v40  ;;  %v1806_v40 = vld [vmem:[#allocation15 + $0x1] ss:$0 sm:$0xff] }
 0x82b   :  { %v3206_v43 = vpop.f32.mrf.mxu0 }
 0x82c   :  { %v1356_v44 = vand.u32 2147483647, %v1355_v42  ;;  %vm1376_vm7 = vcmp.lt.f32.partialorder %v1355_v42, 0.0  ;;  %v947_v20 = vadd.f32 %v1790_v19, %v3206_v43 }
 0x82d   :  { %v2292_v9 = vpop.f32.mrf.mxu0 }
 0x82e   :  { %v1357_v45 = vmul.f32 0.3275911, %v1356_v44  ;;  %v1370_v47 = vsub.f32 0.0, %v1356_v44  ;;  %v953_v21 = vmul.f32 0.70710677, %v947_v20 }
 0x830   :  { %v1358_v46 = vadd.f32 1.0, %v1357_v45  ;;  %v1371_v48 = vmul.f32 %v1370_v47, %v1356_v44  ;;  %v1807_v44 = vld [vmem:[#allocation18 + $0x1] ss:$0 sm:$0xff]  ;;  %v954_v22 = vand.u32 2147483647, %v953_v21  ;;  %vm974_vm9 = vcmp.lt.f32.partialorder %v953_v21, 0.0 }
 0x831   :  { %v1791_v21 = vld [vmem:[#allocation25] ss:$0 sm:$0xff] }
 0x832   :  { %2459 = vrcp.f32 %v1358_v46  ;;  %v1372_v50 = vmul.f32 1.442695, %v1371_v48  ;;  %v955_v23 = vmul.f32 0.3275911, %v954_v22  ;;  %v968_v29 = vsub.f32 0.0, %v954_v22 }
 0x834   :  { %2461 = vpow2.f32 %v1372_v50  ;;  %v956_v24 = vadd.f32 1.0, %v955_v23  ;;  %v969_v1 = vmul.f32 %v968_v29, %v954_v22  ;;  %v1792_v23 = vld [vmem:[#allocation27] ss:$0 sm:$0xff] }
 0x836   :  { %v970_v31 = vmul.f32 1.442695, %v969_v1 }
 0x83f   :  { %v2460_v49 = vpop.eup %2459 }
 0x840   :  { %v1361_v51 = vmul.f32 1.0614054, %v2460_v49 }
 0x841   :  { %v2462_v60 = vpop.eup %2461 }
 0x842   :  { %v1362_v52 = vadd.f32 -1.4531521, %v1361_v51 }
 0x844   :  { %v1363_v53 = vmul.f32 %v2460_v49, %v1362_v52 }
 0x846   :  { %v1364_v54 = vadd.f32 1.4214138, %v1363_v53 }
 0x848   :  { %v1365_v55 = vmul.f32 %v2460_v49, %v1364_v54 }
 0x84a   :  { %v1366_v56 = vadd.f32 -0.28449672, %v1365_v55 }
 0x84c   :  { %v1367_v57 = vmul.f32 %v2460_v49, %v1366_v56 }
 0x84e   :  { %v1368_v58 = vadd.f32 0.2548296, %v1367_v57 }
 0x850   :  { %v1369_v59 = vmul.f32 %v2460_v49, %v1368_v58 }
 0x852   :  { %v1374_v61 = vmul.f32 %v2462_v60, %v1369_v59 }
 0x854   :  { %v1375_v62 = vsub.f32 1.0, %v1374_v61 }
 0x856   :  { %v1377_v63 = vsub.f32 0.0, %v1375_v62 }
 0x858   :  { %v1378_v3 = vsel %vm1376_vm7, %v1377_v63, %v1375_v62 }
 0x859   :  { %v1379_v6 = vadd.f32 1.0, %v1378_v3 }
 0x85b   :  { %v1380_v7 = vmul.f32 %v1379_v6, %v1354_v5 }
 0x85d   :  { %1381 = vadd.xlane.f32.xlu1 %v1380_v7 }
 0x8e6   :  { %v1382_v15 = vpop.xlane.xlu1 %1381 }
 0x8e7   :  { %v1383_v16 = vmul.f32 0.0078125, %v1382_v15  ;;  %v2016_v15 = vunpack.c.h.bf16 %v2059_v13 }
 0x8e9   :  { %v1384_v17 = vsub.f32 %v1380_v7, %v1383_v16  ;;  %v2015_v16 = vunpack.c.l.bf16 %v2059_v13  ;;  %2378 = vmatpush3.msra.mxu1 %v2016_v15  ;;  %v1808_v13 = vld [vmem:[#allocation19 + $0x1] ss:$0 sm:$0xff]  ;;  %v1809_v15 = vld [vmem:[#allocation21 + $0x1] ss:$0 sm:$0xff] }
 0x8ea   :  { %2379 = vmatprep.subr.mxu1 %v2862_v0 }
 0x8eb   :  { %v1385_v18 = vmul.f32 %v1384_v17, %v1384_v17  ;;  %2380 = vmatpush3.msra.mxu1 %v2015_v16 }
 0x8ec   :  { %2381 = vmatprep.subr.mxu1 %v2862_v0 }
 0x8ed   :  { %1386 = vadd.xlane.f32.xlu1 %v1385_v18  ;;  %v2011_v18 = vunpack.c.l.bf16 %v2058_v14 }
 0x976   :  { %v1387_v33 = vpop.xlane.xlu1 %1386 }
 0x977   :  { %v1388_v2 = vmul.f32 0.0078125, %v1387_v33 }
 0x979   :  { %v1389_v36 = vadd.f32 1e-05, %v1388_v2 }
 0x97b   :  { %2463 = vrsqrt.f32 %v1389_v36 }
 0x988   :  { %v2464_v37 = vpop.eup %2463 }
 0x989   :  { %v1391_v38 = vmul.f32 %v2464_v37, %v1384_v17  ;;  %v2012_v17 = vunpack.c.h.bf16 %v2058_v14 }
 0x98b   :  { %v1398_v41 = vmul.f32 %v1805_v39, %v1391_v38  ;;  %2382 = vmatpush3.msra.mxu1 %v2012_v17 }
 0x98c   :  { %2383 = vmatprep.subr.mxu1 %v2862_v0 }
 0x98d   :  { %v1405_v42 = vadd.f32 %v1806_v40, %v1398_v41  ;;  %2384 = vmatpush3.msra.mxu1 %v2011_v18 }
 0x98e   :  { %2385 = vmatprep.subr.mxu1 %v2862_v0 }
 0x98f   :  { %2375 = vmatmul.mubr.f32.vlgmr.msra.gmra.mxu0 %v1405_v42 }
 0xa4f   :  { %v1513_v9 = vpop.f32.mrf.mxu0 }
 0xa50   :  { %v1514_v45 = vadd.f32 %v1807_v44, %v1513_v9  ;;  %v952_v9 = vmul.f32 0.5, %v947_v20 }
 0xa51   :  { %v2376_v46 = vpop.f32.mrf.mxu0 }
 0xa52   :  { %v1522_v47 = vmul.f32 0.70710677, %v1514_v45  ;;  %v1521_v10 = vmul.f32 0.5, %v1514_v45  ;;  %v2057_v46 = vld [vmem:[#allocation22 + $0x68] sm:$0xff]  }
 0xa54   :  { %v1523_v48 = vand.u32 2147483647, %v1522_v47  ;;  %vm1543_vm8 = vcmp.lt.f32.partialorder %v1522_v47, 0.0  ;;  %v2008_v47 = vunpack.c.h.bf16 %v2057_v46 }
 0xa56   :  { %v1524_v49 = vmul.f32 0.3275911, %v1523_v48  ;;  %v1537_v51 = vsub.f32 0.0, %v1523_v48  ;;  %2386 = vmatpush3.msra.mxu1 %v2008_v47 }
 0xa57   :  { %2387 = vmatprep.subr.mxu1 %v2862_v0 }
 0xa58   :  { %v1525_v50 = vadd.f32 1.0, %v1524_v49  ;;  %v1538_v52 = vmul.f32 %v1537_v51, %v1523_v48  ;;  %v2007_v48 = vunpack.c.l.bf16 %v2057_v46  ;;  %v2056_v49 = vld [vmem:[#allocation22 + $0x60] sm:$0xff]  }
 0xa59   :  { %v2003_v51 = vunpack.c.l.bf16 %v2056_v49 }
 0xa5a   :  { %2465 = vrcp.f32 %v1525_v50  ;;  %v1539_v54 = vmul.f32 1.442695, %v1538_v52  ;;  %2388 = vmatpush3.msra.mxu1 %v2007_v48  ;;  %v2004_v50 = vunpack.c.h.bf16 %v2056_v49  ;;  %v2055_v52 = vld [vmem:[#allocation22 + $0x58] sm:$0xff]  }
 0xa5b   :  { %2389 = vmatprep.subr.mxu1 %v2862_v0 }
 0xa5c   :  { %2467 = vpow2.f32 %v1539_v54  ;;  %2390 = vmatpush3.msra.mxu1 %v2004_v50  ;;  %v1999_v54 = vunpack.c.l.bf16 %v2055_v52 }
 0xa5d   :  { %2469 = vrcp.f32 %v956_v24  ;;  %2391 = vmatprep.subr.mxu1 %v2862_v0 }
 0xa5e   :  { %2471 = vpow2.f32 %v970_v31  ;;  %2392 = vmatpush3.msra.mxu1 %v2003_v51 }
 0xa5f   :  { %2393 = vmatprep.subr.mxu1 %v2862_v0 }
 0xa67   :  { %v2466_v53 = vpop.eup %2465 }
 0xa68   :  { %v1528_v55 = vmul.f32 1.0614054, %v2466_v53 }
 0xa69   :  { %v2468_v3 = vpop.eup %2467 }
 0xa6a   :  { %v1529_v56 = vadd.f32 -1.4531521, %v1528_v55  ;;  %v2470_v25 = vpop.eup %2469  ;;  %v2054_v55 = vld [vmem:[#allocation22 + $0x50] sm:$0xff]  }
 0xa6b   :  { %v959_v26 = vmul.f32 1.0614054, %v2470_v25  ;;  %v2472_v43 = vpop.eup %2471 }
 0xa6c   :  { %v1530_v57 = vmul.f32 %v2466_v53, %v1529_v56  ;;  %v2053_v56 = vld [vmem:[#allocation22 + $0x48] sm:$0xff]  }
 0xa6d   :  { %v960_v27 = vadd.f32 -1.4531521, %v959_v26 }
 0xa6e   :  { %v1531_v58 = vadd.f32 1.4214138, %v1530_v57  ;;  %v1996_v57 = vunpack.c.h.bf16 %v2054_v55 }
 0xa6f   :  { %v961_v28 = vmul.f32 %v2470_v25, %v960_v27 }
 0xa70   :  { %v1532_v59 = vmul.f32 %v2466_v53, %v1531_v58  ;;  %v1995_v58 = vunpack.c.l.bf16 %v2054_v55 }
 0xa71   :  { %v962_v30 = vadd.f32 1.4214138, %v961_v28  ;;  %v1810_v28 = vld [vmem:[#allocation24 + $0x1] ss:$0 sm:$0xff] }
 0xa72   :  { %v1533_v60 = vadd.f32 -0.28449672, %v1532_v59  ;;  %v1992_v59 = vunpack.c.h.bf16 %v2053_v56 }
 0xa73   :  { %v963_v4 = vmul.f32 %v2470_v25, %v962_v30 }
 0xa74   :  { %v1534_v61 = vmul.f32 %v2466_v53, %v1533_v60  ;;  %v1986_v60 = vld [vmem:[#allocation22 + $0x40] sm:$0xff]  }
 0xa75   :  { %v964_v32 = vadd.f32 -0.28449672, %v963_v4 }
 0xa76   :  { %v1535_v62 = vadd.f32 0.2548296, %v1534_v61  ;;  %v1991_v61 = vunpack.c.l.bf16 %v2053_v56 }
 0xa77   :  { %v965_v34 = vmul.f32 %v2470_v25, %v964_v32 }
 0xa78   :  { %v1536_v63 = vmul.f32 %v2466_v53, %v1535_v62  ;;  %v2000_v53 = vunpack.c.h.bf16 %v2055_v52  ;;  %v1988_v62 = vunpack.c.h.bf16 %v1986_v60 }
 0xa79   :  { %v966_v35 = vadd.f32 0.2548296, %v965_v34 }
 0xa7a   :  { %v1541_v5 = vmul.f32 %v2468_v3, %v1536_v63  ;;  %2394 = vmatpush3.msra.mxu1 %v2000_v53  ;;  %v1987_v63 = vunpack.c.l.bf16 %v1986_v60  ;;  %v1794_v53 = vld [vmem:[%s3278_s20] ss:$0 sm:$0xff] }
 0xa7b   :  { %v967_v33 = vmul.f32 %v2470_v25, %v966_v35  ;;  %2395 = vmatprep.subr.mxu1 %v2862_v0  ;;  %v1793_v25 = vld [vmem:[%s3277_s19] ss:$0 sm:$0xff] }
 0xa7c   :  { %v1542_v6 = vsub.f32 1.0, %v1541_v5  ;;  %2396 = vmatpush3.msra.mxu1 %v1999_v54 }
 0xa7d   :  { %v972_v2 = vmul.f32 %v2472_v43, %v967_v33  ;;  %2397 = vmatprep.subr.mxu1 %v2862_v0 }
 0xa7e   :  { %v1544_v7 = vsub.f32 0.0, %v1542_v6  ;;  %2398 = vmatpush3.msra.mxu1 %v1996_v57 }
 0xa7f   :  { %v973_v36 = vsub.f32 1.0, %v972_v2  ;;  %2399 = vmatprep.subr.mxu1 %v2862_v0 }
 0xa80   :  { %v1545_v8 = vsel %vm1543_vm8, %v1544_v7, %v1542_v6  ;;  %2400 = vmatpush3.msra.mxu1 %v1995_v58 }
 0xa81   :  { %v1546_v11 = vadd.f32 1.0, %v1545_v8  ;;  %v975_v37 = vsub.f32 0.0, %v973_v36  ;;  %2401 = vmatprep.subr.mxu1 %v2862_v0 }
 0xa82   :  { %2402 = vmatpush3.msra.mxu1 %v1992_v59 }
 0xa83   :  { %v1547_v12 = vmul.f32 %v1546_v11, %v1521_v10  ;;  %v976_v40 = vsel %vm974_vm9, %v975_v37, %v973_v36  ;;  %2403 = vmatprep.subr.mxu1 %v2862_v0 }
 0xa84   :  { %v977_v44 = vadd.f32 1.0, %v976_v40  ;;  %2404 = vmatpush3.msra.mxu1 %v1991_v61 }
 0xa85   :  { %1548 = vadd.xlane.f32.xlu0 %v1547_v12  ;;  %2405 = vmatprep.subr.mxu1 %v2862_v0 }
 0xa86   :  { %v978_v45 = vmul.f32 %v977_v44, %v952_v9  ;;  %2406 = vmatpush3.msra.mxu1 %v1988_v62 }
 0xa87   :  { %2407 = vmatprep.subr.mxu1 %v2862_v0 }
 0xa88   :  { %2408 = vmatpush3.msra.mxu1 %v1987_v63 }
 0xb0e   :  { %v1549_v39 = vpop.xlane.xlu0 %1548 }
 0xb0f   :  { %v1550_v38 = vmul.f32 0.0078125, %v1549_v39 }
 0xb11   :  { %v1551_v41 = vsub.f32 %v1547_v12, %v1550_v38 }
 0xb13   :  { %v1552_v42 = vmul.f32 %v1551_v41, %v1551_v41 }
 0xb15   :  { %1553 = vadd.xlane.f32.xlu1 %v1552_v42 }
 0xb19   :  { %979 = vadd.xlane.f32.xlu1 %v978_v45 }
 0xb9e   :  { %v1554_v3 = vpop.xlane.xlu1 %1553 }
 0xb9f   :  { %v1555_v5 = vmul.f32 0.0078125, %v1554_v3  ;;  %v1811_v3 = vld [vmem:[#allocation25 + $0x1] ss:$0 sm:$0xff] }
 0xba1   :  { %v1556_v6 = vadd.f32 1e-05, %v1555_v5 }
 0xba2   :  { %v980_v7 = vpop.xlane.xlu1 %979 }
 0xba3   :  { %2473 = vrsqrt.f32 %v1556_v6  ;;  %v981_v8 = vmul.f32 0.0078125, %v980_v7  ;;  %v1812_v6 = vld [vmem:[#allocation27 + $0x1] ss:$0 sm:$0xff] }
 0xba5   :  { %v982_v10 = vsub.f32 %v978_v45, %v981_v8  ;;  %v1814_v8 = vld [vmem:[%s3277_s19 + $0x1] ss:$0 sm:$0xff] }
 0xba7   :  { %v983_v11 = vmul.f32 %v982_v10, %v982_v10 }
 0xba9   :  { %984 = vadd.xlane.f32.xlu1 %v983_v11 }
 0xbb0   :  { %v2474_v12 = vpop.eup %2473 }
 0xbb1   :  { %v1558_v14 = vmul.f32 %v2474_v12, %v1551_v41  ;;  %v1816_v12 = vld [vmem:[%s3278_s20 + $0x1] ss:$0 sm:$0xff] }
 0xbb3   :  { %v1565_v16 = vmul.f32 %v1808_v13, %v1558_v14 }
 0xbb5   :  { %v1572_v17 = vadd.f32 %v1809_v15, %v1565_v16 }
 0xbb7   :  { %2410 = vmatmul.mubr.f32.vlgmr.msra.gmra.mxu1 %v1572_v17 }
 0xc32   :  { %v985_v18 = vpop.xlane.xlu1 %984 }
 0xc33   :  { %v986_v19 = vmul.f32 0.0078125, %v985_v18 }
 0xc35   :  { %v987_v0 = vadd.f32 1e-05, %v986_v19 }
 0xc37   :  { %2475 = vrsqrt.f32 %v987_v0 }
 0xc44   :  { %v2476_v20 = vpop.eup %2475 }
 0xc45   :  { %v989_v22 = vmul.f32 %v2476_v20, %v982_v10 }
 0xc47   :  { %v996_v24 = vmul.f32 %v1791_v21, %v989_v22 }
 0xc49   :  { %v1003_v26 = vadd.f32 %v1792_v23, %v996_v24 }
 0xc4b   :  { %v1011_v27 = vmul.f32 %v1793_v25, %v1003_v26 }
 0xc4d   :  { %1012 = vadd.xlane.f32.xlu1 %v1011_v27 }
 0xc77   :  { %v1680_v29 = vpop.f32.mrf.mxu1 }
 0xc78   :  { %v1681_v30 = vadd.f32 %v1810_v28, %v1680_v29 }
 0xc79   :  { %v2411_v1 = vpop.f32.mrf.mxu1 }
 0xc7a   :  { %v1689_v4 = vmul.f32 0.70710677, %v1681_v30  ;;  %v1688_v50 = vmul.f32 0.5, %v1681_v30 }
 0xc7c   :  { %v1690_v31 = vand.u32 2147483647, %v1689_v4  ;;  %vm1710_vm10 = vcmp.lt.f32.partialorder %v1689_v4, 0.0 }
 0xc7e   :  { %v1691_v32 = vmul.f32 0.3275911, %v1690_v31  ;;  %v1704_v35 = vsub.f32 0.0, %v1690_v31 }
 0xc80   :  { %v1692_v34 = vadd.f32 1.0, %v1691_v32  ;;  %v1705_v33 = vmul.f32 %v1704_v35, %v1690_v31 }
 0xc82   :  { %2477 = vrcp.f32 %v1692_v34  ;;  %v1706_v2 = vmul.f32 1.442695, %v1705_v33 }
 0xc84   :  { %2479 = vpow2.f32 %v1706_v2 }
 0xc8f   :  { %v2478_v43 = vpop.eup %2477 }
 0xc90   :  { %v1695_v36 = vmul.f32 1.0614054, %v2478_v43 }
 0xc91   :  { %v2480_v45 = vpop.eup %2479 }
 0xc92   :  { %v1696_v37 = vadd.f32 -1.4531521, %v1695_v36 }
 0xc94   :  { %v1697_v39 = vmul.f32 %v2478_v43, %v1696_v37 }
 0xc96   :  { %v1698_v38 = vadd.f32 1.4214138, %v1697_v39 }
 0xc98   :  { %v1699_v40 = vmul.f32 %v2478_v43, %v1698_v38 }
 0xc9a   :  { %v1700_v41 = vadd.f32 -0.28449672, %v1699_v40 }
 0xc9c   :  { %v1701_v42 = vmul.f32 %v2478_v43, %v1700_v41 }
 0xc9e   :  { %v1702_v44 = vadd.f32 0.2548296, %v1701_v42 }
 0xca0   :  { %v1703_v9 = vmul.f32 %v2478_v43, %v1702_v44 }
 0xca2   :  { %v1708_v46 = vmul.f32 %v2480_v45, %v1703_v9 }
 0xca4   :  { %v1709_v47 = vsub.f32 1.0, %v1708_v46 }
 0xca6   :  { %v1711_v48 = vsub.f32 0.0, %v1709_v47 }
 0xca8   :  { %v1712_v49 = vsel %vm1710_vm10, %v1711_v48, %v1709_v47 }
 0xca9   :  { %v1713_v51 = vadd.f32 1.0, %v1712_v49 }
 0xcab   :  { %v1714_v52 = vmul.f32 %v1713_v51, %v1688_v50 }
 0xcad   :  { %1715 = vadd.xlane.f32.xlu0 %v1714_v52 }
 0xcd6   :  { %v1013_v54 = vpop.xlane.xlu1 %1012 }
 0xcd7   :  { %v1021_v55 = vadd.f32 %v1794_v53, %v1013_v54 }
 0xcd9   :  { %1023 = vst.msk [vmem:[%s3279_s21] sm:$0xff] %vm1022_vm11, %v1021_v55 }
 0xd36   :  { %v1716_v56 = vpop.xlane.xlu0 %1715 }
 0xd37   :  { %v1717_v57 = vmul.f32 0.0078125, %v1716_v56 }
 0xd39   :  { %v1718_v58 = vsub.f32 %v1714_v52, %v1717_v57 }
 0xd3b   :  { %v1719_v59 = vmul.f32 %v1718_v58, %v1718_v58 }
 0xd3d   :  { %1720 = vadd.xlane.f32.xlu0 %v1719_v59 }
 0xdc6   :  { %v1721_v60 = vpop.xlane.xlu0 %1720 }
 0xdc7   :  { %v1722_v61 = vmul.f32 0.0078125, %v1721_v60 }
 0xdc9   :  { %v1723_v62 = vadd.f32 1e-05, %v1722_v61 }
 0xdcb   :  { %2481 = vrsqrt.f32 %v1723_v62 }
 0xdd8   :  { %v2482_v63 = vpop.eup %2481 }
 0xdd9   :  { %v1725_v5 = vmul.f32 %v2482_v63, %v1718_v58 }
 0xddb   :  { %v1732_v7 = vmul.f32 %v1811_v3, %v1725_v5 }
 0xddd   :  { %v1739_v10 = vadd.f32 %v1812_v6, %v1732_v7 }
 0xddf   :  { %v1748_v11 = vmul.f32 %v1814_v8, %v1739_v10 }
 0xde1   :  { %1749 = vadd.xlane.f32.xlu0 %v1748_v11 }
 0xe6a   :  { %v1750_v13 = vpop.xlane.xlu0 %1749 }
 0xe6b   :  { %v1759_v14 = vadd.f32 %v1816_v12, %v1750_v13 }
 0xe6d   :  { %1761 = vrot.lane.b32.xlu0 %v1759_v14, %s2845_s23 }
 0xedf   :  { %v1762_v15 = vpop.permute.xlu0 %1761 }
 0xee0   :  { %1765 = vst.msk [vmem:[%s3279_s21] sm:$0xff] %vm1764_vm12, %v1762_v15 }
 0xee1   :  { %1770 = vsyncpa [#allocation3], 1 }
 0xee2   :  { %1771 = vsyncpa [#allocation5], 1 }
 0xee3   :  { %1772 = vsyncpa [#allocation8], 1 }
 0xee4   :  { %1773 = vsyncpa [#allocation11], 1 }
 0xee5   :  { %1774 = vsyncpa [#allocation14], 1 }
 0xee6   :  { %1775 = vsyncpa [#allocation17], 1 }
 0xee7   :  { %1776 = vsyncpa [#allocation20], 1 }
 0xee8   :  { %1777 = vsyncpa [#allocation23], 1 }
 0xee9   :  { %1778 = vsyncpa [#allocation26], 1 }

</bundles_post_ra>
